<compile_context>
chip_gen: v6e
topology: v6e:2x2x1
jax: 0.10.0
libtpu: 0.0.40
codegen_flags: <defaults>
</compile_context>

<pallas_src>
import numpy as np
import jax
import jax.numpy as jnp
from jax import lax
from jax.experimental import pallas as pl
from jax.experimental.pallas import tpu as pltpu

_HALF_LOG_2PI = float(0.5 * np.log(2.0 * np.pi))
_OUT_W = 128          # lane-dense packed loss-output width (one full vreg row)


def _lgamma(z):
    """log-gamma for z > 0 (elementwise, f32).

    Shift z up by 8 via ONE log per 4-term product (split 4+4 so the partial
    products cannot overflow f32 for z up to ~4e9), then a 3-term Stirling
    series at w = z + 8.  ~4 transcendentals per element instead of ~9.
    """
    p_lo = z * (z + 1.0) * (z + 2.0) * (z + 3.0)
    p_hi = (z + 4.0) * (z + 5.0) * (z + 6.0) * (z + 7.0)
    shift = jnp.log(p_lo) + jnp.log(p_hi)
    w = z + 8.0
    inv_w = pl.reciprocal(w, approx=True)      # EUP; error << series magnitude
    inv_w2 = inv_w * inv_w
    series = inv_w * (1.0 / 12.0 - inv_w2 * (1.0 / 360.0 - inv_w2 * (1.0 / 1260.0)))
    return (w - 0.5) * jnp.log(w) - w + _HALF_LOG_2PI + series - shift


# ----------------------------------------------------------------------------
# The single fused TOTALVAE forward kernel (all intermediates VMEM-resident)
# ----------------------------------------------------------------------------
def _totalvae_kernel(
    # data / reparameterization noise
    x_ref, y_ref, eps_z_ref, eps_back_ref,
    # encoder (BN folded into Linear weights, eval mode)
    w_enc0_x_ref, w_enc0_y_ref, b_enc0_ref,
    w_enc1_ref, b_enc1_ref,
    w_z_ref, b_z_ref,
    # decoder
    w_px_dec_ref, b_px_dec_ref,
    w_pxs_h_ref, w_pxs_z_ref, b_pxs_ref,
    w_back_dec_ref, b_back_dec_ref,
    w_back_h_ref, w_back_z_ref, b_back_ref,
    w_fore_dec_ref, b_fore_dec_ref,
    w_fore_h_ref, w_fore_z_ref, b_fore_ref,
    w_sig_dec_ref, b_sig_dec_ref,
    w_mix_h_ref, w_mix_z_ref, b_mix_ref,
    # dispersions / protein-background prior
    px_r_ref, py_r_ref, bg_alpha_ref, bg_log_beta_ref,
    # packed output (B, _OUT_W): cols 0..3 = [rl_gene, rl_prot, kl_z, kl_back]
    out_ref,
):
    eps = 1e-8
    L = eps_z_ref.shape[1]
    P = eps_back_ref.shape[1]

    def dot(a, b):
        return jnp.dot(a, b, preferred_element_type=jnp.float32)

    def relu(v):
        return jnp.maximum(v, 0.0)

    x = x_ref[...]
    y = y_ref[...]
    x_log = jnp.log(1.0 + x)                             # log_variational=True
    y_log = jnp.log(1.0 + y)
    library_gene = jnp.sum(x, axis=-1, keepdims=True)    # observed library size

    # ----------------------------- encoder ----------------------------------
    h = relu(dot(x_log, w_enc0_x_ref[...]) + dot(y_log, w_enc0_y_ref[...])
             + b_enc0_ref[...])
    h = relu(dot(h, w_enc1_ref[...]) + b_enc1_ref[...])
    zz = dot(h, w_z_ref[...]) + b_z_ref[...]             # (B, 2L) = [mean | logvar]
    qz_m = zz[:, :L]
    qz_v = jnp.exp(zz[:, L:]) + 1e-4
    z = qz_m + jnp.sqrt(qz_v) * eps_z_ref[...]           # 'normal' latent -> identity

    # ----------------------------- decoder ----------------------------------
    px_h = relu(dot(z, w_px_dec_ref[...]) + b_px_dec_ref[...])
    unnorm = (dot(px_h, w_pxs_h_ref[...]) + dot(z, w_pxs_z_ref[...])
              + b_pxs_ref[...])                          # = cat(px_h, z) @ W
    smax = jnp.max(unnorm, axis=-1, keepdims=True)
    e = jnp.exp(unnorm - smax)
    px_scale = e / jnp.sum(e, axis=-1, keepdims=True)
    px_rate = library_gene * px_scale

    back_h = relu(dot(z, w_back_dec_ref[...]) + b_back_dec_ref[...])
    back_out = (dot(back_h, w_back_h_ref[...]) + dot(z, w_back_z_ref[...])
                + b_back_ref[...])                       # (B, 2P) = [alpha | log_beta]
    back_alpha = back_out[:, :P]
    back_beta = jnp.exp(back_out[:, P:])
    log_pro_back_mean = back_alpha + back_beta * eps_back_ref[...]
    rate_back = jnp.exp(log_pro_back_mean)

    fore_h = relu(dot(z, w_fore_dec_ref[...]) + b_fore_dec_ref[...])
    fore_scale = relu(dot(fore_h, w_fore_h_ref[...]) + dot(z, w_fore_z_ref[...])
                      + b_fore_ref[...]) + 1.0 + 1e-8
    rate_fore = rate_back * fore_scale

    sig_h = relu(dot(z, w_sig_dec_ref[...]) + b_sig_dec_ref[...])
    mixing = (dot(sig_h, w_mix_h_ref[...]) + dot(z, w_mix_z_ref[...])
              + b_mix_ref[...])

    # ------------------- gene NB reconstruction loss ------------------------
    theta_g = jnp.exp(px_r_ref[...])                     # (1, G)
    log_theta_g = jnp.log(theta_g + eps)                 # hoisted per-feature
    lg_theta_g = _lgamma(theta_g)
    log_theta_mu = jnp.log(theta_g + px_rate + eps)
    log_nb = (theta_g * (log_theta_g - log_theta_mu)
              + x * (jnp.log(px_rate + eps) - log_theta_mu)
              + _lgamma(x + theta_g) - lg_theta_g - _lgamma(x + 1.0))
    rl_gene = -jnp.sum(log_nb, axis=-1, keepdims=True)

    # --------------- protein NB-mixture reconstruction loss -----------------
    theta_p = jnp.exp(py_r_ref[...])                     # (1, P)
    log_theta_p = jnp.log(theta_p + eps)
    lg_t = _lgamma(theta_p)                              # hoisted per-feature
    lg_yt = _lgamma(y + theta_p)
    lg_y1 = _lgamma(y + 1.0)
    lt1 = jnp.log(theta_p + rate_back + eps)
    lt2 = jnp.log(theta_p + rate_fore + eps)
    lnb1 = (theta_p * (log_theta_p - lt1) + y * (jnp.log(rate_back + eps) - lt1)
            + lg_yt - lg_t - lg_y1)
    lnb2 = (theta_p * (log_theta_p - lt2) + y * (jnp.log(rate_fore + eps) - lt2)
            + lg_yt - lg_t - lg_y1)
    a = lnb1
    b = lnb2 - mixing
    mab = jnp.maximum(a, b)
    lse = mab + jnp.log(jnp.exp(a - mab) + jnp.exp(b - mab))
    softplus_neg_pi = jnp.maximum(-mixing, 0.0) + jnp.log(1.0 + jnp.exp(-jnp.abs(mixing)))
    rl_prot = -jnp.sum(lse - softplus_neg_pi, axis=-1, keepdims=True)

    # ----------------------------- KL terms ----------------------------------
    kl_z = jnp.sum(0.5 * (qz_v + qz_m * qz_m - 1.0 - jnp.log(qz_v)),
                   axis=-1, keepdims=True)

    prior_mean = bg_alpha_ref[...]                       # (1, P)
    inv_prior_scale = jnp.exp(-bg_log_beta_ref[...])     # 1 / exp(log_beta)
    ratio = back_beta * inv_prior_scale
    var_ratio = ratio * ratio
    t1 = (back_alpha - prior_mean) * inv_prior_scale
    kl_back = jnp.sum(0.5 * (var_ratio + t1 * t1 - 1.0 - jnp.log(var_ratio)),
                      axis=-1, keepdims=True)

    # ------------- pack all losses into one lane-dense output ---------------
    col = lax.broadcasted_iota(jnp.int32, out_ref.shape, 1)
    out_ref[...] = (jnp.where(col == 0, rl_gene, 0.0)
                    + jnp.where(col == 1, rl_prot, 0.0)
                    + jnp.where(col == 2, kl_z, 0.0)
                    + jnp.where(col == 3, kl_back, 0.0))


# ----------------------------------------------------------------------------
# Parameter init (deterministic, mirrors module __init__ shapes; BN folded,
# sibling heads pre-merged, cat(h, z) heads pre-split at row H)
# ----------------------------------------------------------------------------
BN_SCALE = float(1.0 / np.sqrt(1.0 + 1e-3))   # BatchNorm1d eval, init running stats


def _lin_init(key, n_in, n_out, bn=False):
    kw, kb = jax.random.split(key)
    bound = 1.0 / np.sqrt(n_in)
    w = jax.random.uniform(kw, (n_in, n_out), jnp.float32, -bound, bound)
    b = jax.random.uniform(kb, (n_out,), jnp.float32, -bound, bound)
    if bn:                                     # fold eval-mode BatchNorm into Linear
        w = w * BN_SCALE
        b = b * BN_SCALE
    return w, b


def init_params(key, n_genes, n_prot, n_hidden, n_latent):
    G, P, H, L = n_genes, n_prot, n_hidden, n_latent
    ks = iter(jax.random.split(key, 24))
    p = {}
    # EncoderTOTALVI. The library-size encoder branch (l_enc/l_mean/l_logvar)
    # is dead under use_observed_lib_size=True and is therefore elided.
    w, b = _lin_init(next(ks), G + P, H, bn=True)
    p["w_enc0_x"], p["w_enc0_y"], p["b_enc0"] = w[:G], w[G:], b
    p["w_enc1"], p["b_enc1"] = _lin_init(next(ks), H, H, bn=True)
    wm, bm = _lin_init(next(ks), H, L)                 # z mean head
    wv, bv = _lin_init(next(ks), H, L)                 # z logvar head
    p["w_z"] = jnp.concatenate([wm, wv], axis=1)       # merged (H, 2L)
    p["b_z"] = jnp.concatenate([bm, bv])
    # DecoderTOTALVI. The px_dropout head is dead under gene_likelihood='nb'.
    p["w_px_dec"], p["b_px_dec"] = _lin_init(next(ks), L, H, bn=True)
    w, b = _lin_init(next(ks), H + L, G)
    p["w_pxs_h"], p["w_pxs_z"], p["b_pxs"] = w[:H], w[H:], b
    p["w_back_dec"], p["b_back_dec"] = _lin_init(next(ks), L, H, bn=True)
    wa, ba = _lin_init(next(ks), H + L, P)             # back_alpha head
    wb, bb = _lin_init(next(ks), H + L, P)             # back_log_beta head
    p["w_back_h"] = jnp.concatenate([wa[:H], wb[:H]], axis=1)   # (H, 2P)
    p["w_back_z"] = jnp.concatenate([wa[H:], wb[H:]], axis=1)   # (L, 2P)
    p["b_back"] = jnp.concatenate([ba, bb])
    p["w_fore_dec"], p["b_fore_dec"] = _lin_init(next(ks), L, H, bn=True)
    w, b = _lin_init(next(ks), H + L, P)
    p["w_fore_h"], p["w_fore_z"], p["b_fore"] = w[:H], w[H:], b
    p["w_sig_dec"], p["b_sig_dec"] = _lin_init(next(ks), L, H, bn=True)
    w, b = _lin_init(next(ks), H + L, P)
    p["w_mix_h"], p["w_mix_z"], p["b_mix"] = w[:H], w[H:], b
    # dispersions / protein background prior (n_batch == 0 -> vectors)
    p["px_r"] = jax.random.normal(next(ks), (G,), jnp.float32)
    p["py_r"] = 2.0 * jax.random.uniform(next(ks), (P,), jnp.float32)
    p["bg_alpha"] = jax.random.normal(next(ks), (P,), jnp.float32)
    p["bg_log_beta"] = jnp.clip(jax.random.normal(next(ks), (P,), jnp.float32), -10.0, 1.0)
    return p


# ----------------------------------------------------------------------------
# TOTALVAE.forward — one pallas_call, intermediates never leave VMEM
# ----------------------------------------------------------------------------
def _totalvae_forward_impl(params, x, y, local_l_mean_gene, local_l_var_gene, key):
    # local_l_mean/var only enter kl_div_l_gene, which is 0.0 for
    # use_observed_lib_size=True (module default) — kept for interface parity.
    del local_l_mean_gene, local_l_var_gene
    p = params
    B = x.shape[0]
    L = p["w_pxs_z"].shape[0]
    P = y.shape[1]

    k_z, k_back = jax.random.split(key, 2)
    eps_z = jax.random.normal(k_z, (B, L), jnp.float32)
    eps_back = jax.random.normal(k_back, (B, P), jnp.float32)
    # TODO(synk): could draw the noise in-kernel via pltpu.prng_seed +
    # pltpu.stateful_normal to make the whole forward a single launch.

    r = lambda v: v.reshape(1, -1)
    args = (
        x, y, eps_z, eps_back,
        p["w_enc0_x"], p["w_enc0_y"], r(p["b_enc0"]),
        p["w_enc1"], r(p["b_enc1"]),
        p["w_z"], r(p["b_z"]),
        p["w_px_dec"], r(p["b_px_dec"]),
        p["w_pxs_h"], p["w_pxs_z"], r(p["b_pxs"]),
        p["w_back_dec"], r(p["b_back_dec"]),
        p["w_back_h"], p["w_back_z"], r(p["b_back"]),
        p["w_fore_dec"], r(p["b_fore_dec"]),
        p["w_fore_h"], p["w_fore_z"], r(p["b_fore"]),
        p["w_sig_dec"], r(p["b_sig_dec"]),
        p["w_mix_h"], p["w_mix_z"], r(p["b_mix"]),
        r(p["px_r"]), r(p["py_r"]), r(p["bg_alpha"]), r(p["bg_log_beta"]),
    )
    # No grid: whole arrays resident in VMEM, no pointless double-buffering.
    vmem = pl.BlockSpec(memory_space=pltpu.MemorySpace.VMEM)
    packed = pl.pallas_call(
        _totalvae_kernel,
        out_shape=jax.ShapeDtypeStruct((B, _OUT_W), jnp.float32),
        in_specs=[vmem] * len(args),
        out_specs=vmem,
    )(*args)

    reconst_loss_gene = packed[:, 0]
    reconst_loss_protein = packed[:, 1]
    kl_div_z = packed[:, 2]
    kl_div_back_pro = packed[:, 3]
    kl_div_l_gene = 0.0                                  # use_observed_lib_size=True
    # TODO(synk): protein_batch_mask / 'zinb' / n_batch>0 covariate branches not
    # exercised (module defaults); library encoder & px_dropout head elided as dead.
    return (reconst_loss_gene, reconst_loss_protein, kl_div_z,
            kl_div_l_gene, kl_div_back_pro)


totalvae_forward = jax.jit(_totalvae_forward_impl)


if __name__ == "__main__":
    key = jax.random.PRNGKey(0)
    kp, kx, ky, ks = jax.random.split(key, 4)

    B, G, P, H, L = 8, 128, 32, 32, 8    # batch, genes, proteins, hidden, latent
    params = init_params(kp, G, P, H, L)

    x = jax.random.poisson(kx, 5.0, (B, G)).astype(jnp.float32)
    y = jax.random.poisson(ky, 20.0, (B, P)).astype(jnp.float32)
    local_l_mean = jnp.full((B, 1), float(np.log(5.0 * G)), jnp.float32)
    local_l_var = jnp.ones((B, 1), jnp.float32)

    rl_gene, rl_prot, kl_z, kl_l, kl_back = totalvae_forward(
        params, x, y, local_l_mean, local_l_var, ks)
    jax.block_until_ready((rl_gene, rl_prot, kl_z, kl_back))

    assert rl_gene.shape == (B,) and rl_prot.shape == (B,)
    assert kl_z.shape == (B,) and kl_back.shape == (B,)
    for v in (rl_gene, rl_prot, kl_z, kl_back):
        assert bool(jnp.all(jnp.isfinite(v)))
    print("KERNEL_OK")
</pallas_src>

<mosaic_0001>
module attributes {stable_mosaic.version = 11 : i64} {
  func.func @_totalvae_kernel(%arg0: memref<8x128xf32, #tpu.memory_space<vmem>>, %arg1: memref<8x32xf32, #tpu.memory_space<vmem>>, %arg2: memref<8x8xf32, #tpu.memory_space<vmem>>, %arg3: memref<8x32xf32, #tpu.memory_space<vmem>>, %arg4: memref<128x32xf32, #tpu.memory_space<vmem>>, %arg5: memref<32x32xf32, #tpu.memory_space<vmem>>, %arg6: memref<1x32xf32, #tpu.memory_space<vmem>>, %arg7: memref<32x32xf32, #tpu.memory_space<vmem>>, %arg8: memref<1x32xf32, #tpu.memory_space<vmem>>, %arg9: memref<32x16xf32, #tpu.memory_space<vmem>>, %arg10: memref<1x16xf32, #tpu.memory_space<vmem>>, %arg11: memref<8x32xf32, #tpu.memory_space<vmem>>, %arg12: memref<1x32xf32, #tpu.memory_space<vmem>>, %arg13: memref<32x128xf32, #tpu.memory_space<vmem>>, %arg14: memref<8x128xf32, #tpu.memory_space<vmem>>, %arg15: memref<1x128xf32, #tpu.memory_space<vmem>>, %arg16: memref<8x32xf32, #tpu.memory_space<vmem>>, %arg17: memref<1x32xf32, #tpu.memory_space<vmem>>, %arg18: memref<32x64xf32, #tpu.memory_space<vmem>>, %arg19: memref<8x64xf32, #tpu.memory_space<vmem>>, %arg20: memref<1x64xf32, #tpu.memory_space<vmem>>, %arg21: memref<8x32xf32, #tpu.memory_space<vmem>>, %arg22: memref<1x32xf32, #tpu.memory_space<vmem>>, %arg23: memref<32x32xf32, #tpu.memory_space<vmem>>, %arg24: memref<8x32xf32, #tpu.memory_space<vmem>>, %arg25: memref<1x32xf32, #tpu.memory_space<vmem>>, %arg26: memref<8x32xf32, #tpu.memory_space<vmem>>, %arg27: memref<1x32xf32, #tpu.memory_space<vmem>>, %arg28: memref<32x32xf32, #tpu.memory_space<vmem>>, %arg29: memref<8x32xf32, #tpu.memory_space<vmem>>, %arg30: memref<1x32xf32, #tpu.memory_space<vmem>>, %arg31: memref<1x128xf32, #tpu.memory_space<vmem>>, %arg32: memref<1x32xf32, #tpu.memory_space<vmem>>, %arg33: memref<1x32xf32, #tpu.memory_space<vmem>>, %arg34: memref<1x32xf32, #tpu.memory_space<vmem>>, %arg35: memref<8x128xf32, #tpu.memory_space<vmem>>) attributes {dimension_semantics = [], scalar_prefetch = 0 : i64, scratch_operands = 0 : i64, tpu.core_type = #tpu.core_type<tc>} {
    %c0 = arith.constant 0 : index
    %c0_0 = arith.constant 0 : index
    %0 = vector.load %arg0[%c0, %c0_0] : memref<8x128xf32, #tpu.memory_space<vmem>>, vector<8x128xf32>
    %c0_1 = arith.constant 0 : index
    %c0_2 = arith.constant 0 : index
    %1 = vector.load %arg1[%c0_1, %c0_2] : memref<8x32xf32, #tpu.memory_space<vmem>>, vector<8x32xf32>
    %cst = arith.constant 1.000000e+00 : f32
    %2 = vector.broadcast %cst : f32 to vector<8x128xf32>
    %3 = arith.addf %2, %0 : vector<8x128xf32>
    %4 = math.log %3 : vector<8x128xf32>
    %cst_3 = arith.constant 1.000000e+00 : f32
    %5 = vector.broadcast %cst_3 : f32 to vector<8x32xf32>
    %6 = arith.addf %5, %1 : vector<8x32xf32>
    %7 = math.log %6 : vector<8x32xf32>
    %cst_4 = arith.constant dense<0.000000e+00> : vector<8xf32>
    %8 = vector.multi_reduction <add>, %0, %cst_4 [1] : vector<8x128xf32> to vector<8xf32>
    %9 = vector.shape_cast %8 : vector<8xf32> to vector<8x1xf32>
    %c0_5 = arith.constant 0 : index
    %c0_6 = arith.constant 0 : index
    %10 = vector.load %arg4[%c0_5, %c0_6] : memref<128x32xf32, #tpu.memory_space<vmem>>, vector<128x32xf32>
    %cst_7 = arith.constant dense<0.000000e+00> : vector<8x32xf32>
    %11 = tpu.matmul %4, %10, %cst_7 {dimension_numbers = #tpu.dot_dimension_numbers<[1], [0], [0], [1], [0, 0, 1, 1], [], []>} : vector<8x128xf32>, vector<128x32xf32>, vector<8x32xf32> -> vector<8x32xf32>
    %c0_8 = arith.constant 0 : index
    %c0_9 = arith.constant 0 : index
    %12 = vector.load %arg5[%c0_8, %c0_9] : memref<32x32xf32, #tpu.memory_space<vmem>>, vector<32x32xf32>
    %cst_10 = arith.constant dense<0.000000e+00> : vector<8x32xf32>
    %13 = tpu.matmul %7, %12, %cst_10 {dimension_numbers = #tpu.dot_dimension_numbers<[1], [0], [0], [1], [0, 0, 1, 1], [], []>} : vector<8x32xf32>, vector<32x32xf32>, vector<8x32xf32> -> vector<8x32xf32>
    %14 = arith.addf %11, %13 : vector<8x32xf32>
    %c0_11 = arith.constant 0 : index
    %c0_12 = arith.constant 0 : index
    %15 = vector.load %arg6[%c0_11, %c0_12] : memref<1x32xf32, #tpu.memory_space<vmem>>, vector<1x32xf32>
    %16 = vector.broadcast %15 : vector<1x32xf32> to vector<8x32xf32>
    %17 = arith.addf %14, %16 : vector<8x32xf32>
    %cst_13 = arith.constant 0.000000e+00 : f32
    %18 = vector.broadcast %cst_13 : f32 to vector<8x32xf32>
    %19 = arith.maximumf %17, %18 : vector<8x32xf32>
    %c0_14 = arith.constant 0 : index
    %c0_15 = arith.constant 0 : index
    %20 = vector.load %arg7[%c0_14, %c0_15] : memref<32x32xf32, #tpu.memory_space<vmem>>, vector<32x32xf32>
    %cst_16 = arith.constant dense<0.000000e+00> : vector<8x32xf32>
    %21 = tpu.matmul %19, %20, %cst_16 {dimension_numbers = #tpu.dot_dimension_numbers<[1], [0], [0], [1], [0, 0, 1, 1], [], []>} : vector<8x32xf32>, vector<32x32xf32>, vector<8x32xf32> -> vector<8x32xf32>
    %c0_17 = arith.constant 0 : index
    %c0_18 = arith.constant 0 : index
    %22 = vector.load %arg8[%c0_17, %c0_18] : memref<1x32xf32, #tpu.memory_space<vmem>>, vector<1x32xf32>
    %23 = vector.broadcast %22 : vector<1x32xf32> to vector<8x32xf32>
    %24 = arith.addf %21, %23 : vector<8x32xf32>
    %cst_19 = arith.constant 0.000000e+00 : f32
    %25 = vector.broadcast %cst_19 : f32 to vector<8x32xf32>
    %26 = arith.maximumf %24, %25 : vector<8x32xf32>
    %c0_20 = arith.constant 0 : index
    %c0_21 = arith.constant 0 : index
    %27 = vector.load %arg9[%c0_20, %c0_21] : memref<32x16xf32, #tpu.memory_space<vmem>>, vector<32x16xf32>
    %cst_22 = arith.constant dense<0.000000e+00> : vector<8x16xf32>
    %28 = tpu.matmul %26, %27, %cst_22 {dimension_numbers = #tpu.dot_dimension_numbers<[1], [0], [0], [1], [0, 0, 1, 1], [], []>} : vector<8x32xf32>, vector<32x16xf32>, vector<8x16xf32> -> vector<8x16xf32>
    %c0_23 = arith.constant 0 : index
    %c0_24 = arith.constant 0 : index
    %29 = vector.load %arg10[%c0_23, %c0_24] : memref<1x16xf32, #tpu.memory_space<vmem>>, vector<1x16xf32>
    %30 = vector.broadcast %29 : vector<1x16xf32> to vector<8x16xf32>
    %31 = arith.addf %28, %30 : vector<8x16xf32>
    %32 = vector.extract_strided_slice %31 {offsets = [0, 0], sizes = [8, 8], strides = [1, 1]} : vector<8x16xf32> to vector<8x8xf32>
    %33 = vector.extract_strided_slice %31 {offsets = [0, 8], sizes = [8, 8], strides = [1, 1]} : vector<8x16xf32> to vector<8x8xf32>
    %34 = math.exp %33 : vector<8x8xf32>
    %cst_25 = arith.constant 9.99999974E-5 : f32
    %35 = vector.broadcast %cst_25 : f32 to vector<8x8xf32>
    %36 = arith.addf %34, %35 : vector<8x8xf32>
    %37 = math.sqrt %36 : vector<8x8xf32>
    %c0_26 = arith.constant 0 : index
    %c0_27 = arith.constant 0 : index
    %38 = vector.load %arg2[%c0_26, %c0_27] : memref<8x8xf32, #tpu.memory_space<vmem>>, vector<8x8xf32>
    %39 = arith.mulf %37, %38 : vector<8x8xf32>
    %40 = arith.addf %32, %39 : vector<8x8xf32>
    %c0_28 = arith.constant 0 : index
    %c0_29 = arith.constant 0 : index
    %41 = vector.load %arg11[%c0_28, %c0_29] : memref<8x32xf32, #tpu.memory_space<vmem>>, vector<8x32xf32>
    %cst_30 = arith.constant dense<0.000000e+00> : vector<8x32xf32>
    %42 = tpu.matmul %40, %41, %cst_30 {dimension_numbers = #tpu.dot_dimension_numbers<[1], [0], [0], [1], [0, 0, 1, 1], [], []>} : vector<8x8xf32>, vector<8x32xf32>, vector<8x32xf32> -> vector<8x32xf32>
    %c0_31 = arith.constant 0 : index
    %c0_32 = arith.constant 0 : index
    %43 = vector.load %arg12[%c0_31, %c0_32] : memref<1x32xf32, #tpu.memory_space<vmem>>, vector<1x32xf32>
    %44 = vector.broadcast %43 : vector<1x32xf32> to vector<8x32xf32>
    %45 = arith.addf %42, %44 : vector<8x32xf32>
    %cst_33 = arith.constant 0.000000e+00 : f32
    %46 = vector.broadcast %cst_33 : f32 to vector<8x32xf32>
    %47 = arith.maximumf %45, %46 : vector<8x32xf32>
    %c0_34 = arith.constant 0 : index
    %c0_35 = arith.constant 0 : index
    %48 = vector.load %arg13[%c0_34, %c0_35] : memref<32x128xf32, #tpu.memory_space<vmem>>, vector<32x128xf32>
    %cst_36 = arith.constant dense<0.000000e+00> : vector<8x128xf32>
    %49 = tpu.matmul %47, %48, %cst_36 {dimension_numbers = #tpu.dot_dimension_numbers<[1], [0], [0], [1], [0, 0, 1, 1], [], []>} : vector<8x32xf32>, vector<32x128xf32>, vector<8x128xf32> -> vector<8x128xf32>
    %c0_37 = arith.constant 0 : index
    %c0_38 = arith.constant 0 : index
    %50 = vector.load %arg14[%c0_37, %c0_38] : memref<8x128xf32, #tpu.memory_space<vmem>>, vector<8x128xf32>
    %cst_39 = arith.constant dense<0.000000e+00> : vector<8x128xf32>
    %51 = tpu.matmul %40, %50, %cst_39 {dimension_numbers = #tpu.dot_dimension_numbers<[1], [0], [0], [1], [0, 0, 1, 1], [], []>} : vector<8x8xf32>, vector<8x128xf32>, vector<8x128xf32> -> vector<8x128xf32>
    %52 = arith.addf %49, %51 : vector<8x128xf32>
    %c0_40 = arith.constant 0 : index
    %c0_41 = arith.constant 0 : index
    %53 = vector.load %arg15[%c0_40, %c0_41] : memref<1x128xf32, #tpu.memory_space<vmem>>, vector<1x128xf32>
    %54 = vector.broadcast %53 : vector<1x128xf32> to vector<8x128xf32>
    %55 = arith.addf %52, %54 : vector<8x128xf32>
    %cst_42 = arith.constant dense<0xFF800000> : vector<8xf32>
    %56 = vector.multi_reduction <maximumf>, %55, %cst_42 [1] : vector<8x128xf32> to vector<8xf32>
    %57 = vector.shape_cast %56 : vector<8xf32> to vector<8x1xf32>
    %58 = vector.broadcast %57 : vector<8x1xf32> to vector<8x128xf32>
    %59 = arith.subf %55, %58 : vector<8x128xf32>
    %60 = math.exp %59 : vector<8x128xf32>
    %cst_43 = arith.constant dense<0.000000e+00> : vector<8xf32>
    %61 = vector.multi_reduction <add>, %60, %cst_43 [1] : vector<8x128xf32> to vector<8xf32>
    %62 = vector.shape_cast %61 : vector<8xf32> to vector<8x1xf32>
    %63 = vector.broadcast %62 : vector<8x1xf32> to vector<8x128xf32>
    %64 = arith.divf %60, %63 : vector<8x128xf32>
    %65 = vector.broadcast %9 : vector<8x1xf32> to vector<8x128xf32>
    %66 = arith.mulf %65, %64 : vector<8x128xf32>
    %c0_44 = arith.constant 0 : index
    %c0_45 = arith.constant 0 : index
    %67 = vector.load %arg16[%c0_44, %c0_45] : memref<8x32xf32, #tpu.memory_space<vmem>>, vector<8x32xf32>
    %cst_46 = arith.constant dense<0.000000e+00> : vector<8x32xf32>
    %68 = tpu.matmul %40, %67, %cst_46 {dimension_numbers = #tpu.dot_dimension_numbers<[1], [0], [0], [1], [0, 0, 1, 1], [], []>} : vector<8x8xf32>, vector<8x32xf32>, vector<8x32xf32> -> vector<8x32xf32>
    %c0_47 = arith.constant 0 : index
    %c0_48 = arith.constant 0 : index
    %69 = vector.load %arg17[%c0_47, %c0_48] : memref<1x32xf32, #tpu.memory_space<vmem>>, vector<1x32xf32>
    %70 = vector.broadcast %69 : vector<1x32xf32> to vector<8x32xf32>
    %71 = arith.addf %68, %70 : vector<8x32xf32>
    %cst_49 = arith.constant 0.000000e+00 : f32
    %72 = vector.broadcast %cst_49 : f32 to vector<8x32xf32>
    %73 = arith.maximumf %71, %72 : vector<8x32xf32>
    %c0_50 = arith.constant 0 : index
    %c0_51 = arith.constant 0 : index
    %74 = vector.load %arg18[%c0_50, %c0_51] : memref<32x64xf32, #tpu.memory_space<vmem>>, vector<32x64xf32>
    %cst_52 = arith.constant dense<0.000000e+00> : vector<8x64xf32>
    %75 = tpu.matmul %73, %74, %cst_52 {dimension_numbers = #tpu.dot_dimension_numbers<[1], [0], [0], [1], [0, 0, 1, 1], [], []>} : vector<8x32xf32>, vector<32x64xf32>, vector<8x64xf32> -> vector<8x64xf32>
    %c0_53 = arith.constant 0 : index
    %c0_54 = arith.constant 0 : index
    %76 = vector.load %arg19[%c0_53, %c0_54] : memref<8x64xf32, #tpu.memory_space<vmem>>, vector<8x64xf32>
    %cst_55 = arith.constant dense<0.000000e+00> : vector<8x64xf32>
    %77 = tpu.matmul %40, %76, %cst_55 {dimension_numbers = #tpu.dot_dimension_numbers<[1], [0], [0], [1], [0, 0, 1, 1], [], []>} : vector<8x8xf32>, vector<8x64xf32>, vector<8x64xf32> -> vector<8x64xf32>
    %78 = arith.addf %75, %77 : vector<8x64xf32>
    %c0_56 = arith.constant 0 : index
    %c0_57 = arith.constant 0 : index
    %79 = vector.load %arg20[%c0_56, %c0_57] : memref<1x64xf32, #tpu.memory_space<vmem>>, vector<1x64xf32>
    %80 = vector.broadcast %79 : vector<1x64xf32> to vector<8x64xf32>
    %81 = arith.addf %78, %80 : vector<8x64xf32>
    %82 = vector.extract_strided_slice %81 {offsets = [0, 0], sizes = [8, 32], strides = [1, 1]} : vector<8x64xf32> to vector<8x32xf32>
    %83 = vector.extract_strided_slice %81 {offsets = [0, 32], sizes = [8, 32], strides = [1, 1]} : vector<8x64xf32> to vector<8x32xf32>
    %84 = math.exp %83 : vector<8x32xf32>
    %c0_58 = arith.constant 0 : index
    %c0_59 = arith.constant 0 : index
    %85 = vector.load %arg3[%c0_58, %c0_59] : memref<8x32xf32, #tpu.memory_space<vmem>>, vector<8x32xf32>
    %86 = arith.mulf %84, %85 : vector<8x32xf32>
    %87 = arith.addf %82, %86 : vector<8x32xf32>
    %88 = math.exp %87 : vector<8x32xf32>
    %c0_60 = arith.constant 0 : index
    %c0_61 = arith.constant 0 : index
    %89 = vector.load %arg21[%c0_60, %c0_61] : memref<8x32xf32, #tpu.memory_space<vmem>>, vector<8x32xf32>
    %cst_62 = arith.constant dense<0.000000e+00> : vector<8x32xf32>
    %90 = tpu.matmul %40, %89, %cst_62 {dimension_numbers = #tpu.dot_dimension_numbers<[1], [0], [0], [1], [0, 0, 1, 1], [], []>} : vector<8x8xf32>, vector<8x32xf32>, vector<8x32xf32> -> vector<8x32xf32>
    %c0_63 = arith.constant 0 : index
    %c0_64 = arith.constant 0 : index
    %91 = vector.load %arg22[%c0_63, %c0_64] : memref<1x32xf32, #tpu.memory_space<vmem>>, vector<1x32xf32>
    %92 = vector.broadcast %91 : vector<1x32xf32> to vector<8x32xf32>
    %93 = arith.addf %90, %92 : vector<8x32xf32>
    %cst_65 = arith.constant 0.000000e+00 : f32
    %94 = vector.broadcast %cst_65 : f32 to vector<8x32xf32>
    %95 = arith.maximumf %93, %94 : vector<8x32xf32>
    %c0_66 = arith.constant 0 : index
    %c0_67 = arith.constant 0 : index
    %96 = vector.load %arg23[%c0_66, %c0_67] : memref<32x32xf32, #tpu.memory_space<vmem>>, vector<32x32xf32>
    %cst_68 = arith.constant dense<0.000000e+00> : vector<8x32xf32>
    %97 = tpu.matmul %95, %96, %cst_68 {dimension_numbers = #tpu.dot_dimension_numbers<[1], [0], [0], [1], [0, 0, 1, 1], [], []>} : vector<8x32xf32>, vector<32x32xf32>, vector<8x32xf32> -> vector<8x32xf32>
    %c0_69 = arith.constant 0 : index
    %c0_70 = arith.constant 0 : index
    %98 = vector.load %arg24[%c0_69, %c0_70] : memref<8x32xf32, #tpu.memory_space<vmem>>, vector<8x32xf32>
    %cst_71 = arith.constant dense<0.000000e+00> : vector<8x32xf32>
    %99 = tpu.matmul %40, %98, %cst_71 {dimension_numbers = #tpu.dot_dimension_numbers<[1], [0], [0], [1], [0, 0, 1, 1], [], []>} : vector<8x8xf32>, vector<8x32xf32>, vector<8x32xf32> -> vector<8x32xf32>
    %100 = arith.addf %97, %99 : vector<8x32xf32>
    %c0_72 = arith.constant 0 : index
    %c0_73 = arith.constant 0 : index
    %101 = vector.load %arg25[%c0_72, %c0_73] : memref<1x32xf32, #tpu.memory_space<vmem>>, vector<1x32xf32>
    %102 = vector.broadcast %101 : vector<1x32xf32> to vector<8x32xf32>
    %103 = arith.addf %100, %102 : vector<8x32xf32>
    %cst_74 = arith.constant 0.000000e+00 : f32
    %104 = vector.broadcast %cst_74 : f32 to vector<8x32xf32>
    %105 = arith.maximumf %103, %104 : vector<8x32xf32>
    %cst_75 = arith.constant 1.000000e+00 : f32
    %106 = vector.broadcast %cst_75 : f32 to vector<8x32xf32>
    %107 = arith.addf %105, %106 : vector<8x32xf32>
    %cst_76 = arith.constant 9.99999993E-9 : f32
    %108 = vector.broadcast %cst_76 : f32 to vector<8x32xf32>
    %109 = arith.addf %107, %108 : vector<8x32xf32>
    %110 = arith.mulf %88, %109 : vector<8x32xf32>
    %c0_77 = arith.constant 0 : index
    %c0_78 = arith.constant 0 : index
    %111 = vector.load %arg26[%c0_77, %c0_78] : memref<8x32xf32, #tpu.memory_space<vmem>>, vector<8x32xf32>
    %cst_79 = arith.constant dense<0.000000e+00> : vector<8x32xf32>
    %112 = tpu.matmul %40, %111, %cst_79 {dimension_numbers = #tpu.dot_dimension_numbers<[1], [0], [0], [1], [0, 0, 1, 1], [], []>} : vector<8x8xf32>, vector<8x32xf32>, vector<8x32xf32> -> vector<8x32xf32>
    %c0_80 = arith.constant 0 : index
    %c0_81 = arith.constant 0 : index
    %113 = vector.load %arg27[%c0_80, %c0_81] : memref<1x32xf32, #tpu.memory_space<vmem>>, vector<1x32xf32>
    %114 = vector.broadcast %113 : vector<1x32xf32> to vector<8x32xf32>
    %115 = arith.addf %112, %114 : vector<8x32xf32>
    %cst_82 = arith.constant 0.000000e+00 : f32
    %116 = vector.broadcast %cst_82 : f32 to vector<8x32xf32>
    %117 = arith.maximumf %115, %116 : vector<8x32xf32>
    %c0_83 = arith.constant 0 : index
    %c0_84 = arith.constant 0 : index
    %118 = vector.load %arg28[%c0_83, %c0_84] : memref<32x32xf32, #tpu.memory_space<vmem>>, vector<32x32xf32>
    %cst_85 = arith.constant dense<0.000000e+00> : vector<8x32xf32>
    %119 = tpu.matmul %117, %118, %cst_85 {dimension_numbers = #tpu.dot_dimension_numbers<[1], [0], [0], [1], [0, 0, 1, 1], [], []>} : vector<8x32xf32>, vector<32x32xf32>, vector<8x32xf32> -> vector<8x32xf32>
    %c0_86 = arith.constant 0 : index
    %c0_87 = arith.constant 0 : index
    %120 = vector.load %arg29[%c0_86, %c0_87] : memref<8x32xf32, #tpu.memory_space<vmem>>, vector<8x32xf32>
    %cst_88 = arith.constant dense<0.000000e+00> : vector<8x32xf32>
    %121 = tpu.matmul %40, %120, %cst_88 {dimension_numbers = #tpu.dot_dimension_numbers<[1], [0], [0], [1], [0, 0, 1, 1], [], []>} : vector<8x8xf32>, vector<8x32xf32>, vector<8x32xf32> -> vector<8x32xf32>
    %122 = arith.addf %119, %121 : vector<8x32xf32>
    %c0_89 = arith.constant 0 : index
    %c0_90 = arith.constant 0 : index
    %123 = vector.load %arg30[%c0_89, %c0_90] : memref<1x32xf32, #tpu.memory_space<vmem>>, vector<1x32xf32>
    %124 = vector.broadcast %123 : vector<1x32xf32> to vector<8x32xf32>
    %125 = arith.addf %122, %124 : vector<8x32xf32>
    %c0_91 = arith.constant 0 : index
    %c0_92 = arith.constant 0 : index
    %126 = vector.load %arg31[%c0_91, %c0_92] : memref<1x128xf32, #tpu.memory_space<vmem>>, vector<1x128xf32>
    %127 = math.exp %126 : vector<1x128xf32>
    %cst_93 = arith.constant 9.99999993E-9 : f32
    %128 = vector.broadcast %cst_93 : f32 to vector<1x128xf32>
    %129 = arith.addf %127, %128 : vector<1x128xf32>
    %130 = math.log %129 : vector<1x128xf32>
    %cst_94 = arith.constant 1.000000e+00 : f32
    %131 = vector.broadcast %cst_94 : f32 to vector<1x128xf32>
    %132 = arith.addf %127, %131 : vector<1x128xf32>
    %133 = arith.mulf %127, %132 : vector<1x128xf32>
    %cst_95 = arith.constant 2.000000e+00 : f32
    %134 = vector.broadcast %cst_95 : f32 to vector<1x128xf32>
    %135 = arith.addf %127, %134 : vector<1x128xf32>
    %136 = arith.mulf %133, %135 : vector<1x128xf32>
    %cst_96 = arith.constant 3.000000e+00 : f32
    %137 = vector.broadcast %cst_96 : f32 to vector<1x128xf32>
    %138 = arith.addf %127, %137 : vector<1x128xf32>
    %139 = arith.mulf %136, %138 : vector<1x128xf32>
    %cst_97 = arith.constant 4.000000e+00 : f32
    %140 = vector.broadcast %cst_97 : f32 to vector<1x128xf32>
    %141 = arith.addf %127, %140 : vector<1x128xf32>
    %cst_98 = arith.constant 5.000000e+00 : f32
    %142 = vector.broadcast %cst_98 : f32 to vector<1x128xf32>
    %143 = arith.addf %127, %142 : vector<1x128xf32>
    %144 = arith.mulf %141, %143 : vector<1x128xf32>
    %cst_99 = arith.constant 6.000000e+00 : f32
    %145 = vector.broadcast %cst_99 : f32 to vector<1x128xf32>
    %146 = arith.addf %127, %145 : vector<1x128xf32>
    %147 = arith.mulf %144, %146 : vector<1x128xf32>
    %cst_100 = arith.constant 7.000000e+00 : f32
    %148 = vector.broadcast %cst_100 : f32 to vector<1x128xf32>
    %149 = arith.addf %127, %148 : vector<1x128xf32>
    %150 = arith.mulf %147, %149 : vector<1x128xf32>
    %151 = math.log %139 : vector<1x128xf32>
    %152 = math.log %150 : vector<1x128xf32>
    %153 = arith.addf %151, %152 : vector<1x128xf32>
    %cst_101 = arith.constant 8.000000e+00 : f32
    %154 = vector.broadcast %cst_101 : f32 to vector<1x128xf32>
    %155 = arith.addf %127, %154 : vector<1x128xf32>
    %156 = tpu.reciprocal %155 {approx = true} : vector<1x128xf32> -> vector<1x128xf32>
    %157 = arith.mulf %156, %156 : vector<1x128xf32>
    %cst_102 = arith.constant 7.93650805E-4 : f32
    %158 = vector.broadcast %cst_102 : f32 to vector<1x128xf32>
    %159 = arith.mulf %157, %158 : vector<1x128xf32>
    %cst_103 = arith.constant 0.00277777785 : f32
    %160 = vector.broadcast %cst_103 : f32 to vector<1x128xf32>
    %161 = arith.subf %160, %159 : vector<1x128xf32>
    %162 = arith.mulf %157, %161 : vector<1x128xf32>
    %cst_104 = arith.constant 0.0833333358 : f32
    %163 = vector.broadcast %cst_104 : f32 to vector<1x128xf32>
    %164 = arith.subf %163, %162 : vector<1x128xf32>
    %165 = arith.mulf %156, %164 : vector<1x128xf32>
    %cst_105 = arith.constant 5.000000e-01 : f32
    %166 = vector.broadcast %cst_105 : f32 to vector<1x128xf32>
    %167 = arith.subf %155, %166 : vector<1x128xf32>
    %168 = math.log %155 : vector<1x128xf32>
    %169 = arith.mulf %167, %168 : vector<1x128xf32>
    %170 = arith.subf %169, %155 : vector<1x128xf32>
    %cst_106 = arith.constant 0.918938517 : f32
    %171 = vector.broadcast %cst_106 : f32 to vector<1x128xf32>
    %172 = arith.addf %170, %171 : vector<1x128xf32>
    %173 = arith.addf %172, %165 : vector<1x128xf32>
    %174 = arith.subf %173, %153 : vector<1x128xf32>
    %175 = vector.broadcast %127 : vector<1x128xf32> to vector<8x128xf32>
    %176 = arith.addf %175, %66 : vector<8x128xf32>
    %cst_107 = arith.constant 9.99999993E-9 : f32
    %177 = vector.broadcast %cst_107 : f32 to vector<8x128xf32>
    %178 = arith.addf %176, %177 : vector<8x128xf32>
    %179 = math.log %178 : vector<8x128xf32>
    %180 = vector.broadcast %130 : vector<1x128xf32> to vector<8x128xf32>
    %181 = arith.subf %180, %179 : vector<8x128xf32>
    %182 = vector.broadcast %127 : vector<1x128xf32> to vector<8x128xf32>
    %183 = arith.mulf %182, %181 : vector<8x128xf32>
    %cst_108 = arith.constant 9.99999993E-9 : f32
    %184 = vector.broadcast %cst_108 : f32 to vector<8x128xf32>
    %185 = arith.addf %66, %184 : vector<8x128xf32>
    %186 = math.log %185 : vector<8x128xf32>
    %187 = arith.subf %186, %179 : vector<8x128xf32>
    %188 = arith.mulf %0, %187 : vector<8x128xf32>
    %189 = arith.addf %183, %188 : vector<8x128xf32>
    %190 = vector.broadcast %127 : vector<1x128xf32> to vector<8x128xf32>
    %191 = arith.addf %0, %190 : vector<8x128xf32>
    %cst_109 = arith.constant 1.000000e+00 : f32
    %192 = vector.broadcast %cst_109 : f32 to vector<8x128xf32>
    %193 = arith.addf %191, %192 : vector<8x128xf32>
    %194 = arith.mulf %191, %193 : vector<8x128xf32>
    %cst_110 = arith.constant 2.000000e+00 : f32
    %195 = vector.broadcast %cst_110 : f32 to vector<8x128xf32>
    %196 = arith.addf %191, %195 : vector<8x128xf32>
    %197 = arith.mulf %194, %196 : vector<8x128xf32>
    %cst_111 = arith.constant 3.000000e+00 : f32
    %198 = vector.broadcast %cst_111 : f32 to vector<8x128xf32>
    %199 = arith.addf %191, %198 : vector<8x128xf32>
    %200 = arith.mulf %197, %199 : vector<8x128xf32>
    %cst_112 = arith.constant 4.000000e+00 : f32
    %201 = vector.broadcast %cst_112 : f32 to vector<8x128xf32>
    %202 = arith.addf %191, %201 : vector<8x128xf32>
    %cst_113 = arith.constant 5.000000e+00 : f32
    %203 = vector.broadcast %cst_113 : f32 to vector<8x128xf32>
    %204 = arith.addf %191, %203 : vector<8x128xf32>
    %205 = arith.mulf %202, %204 : vector<8x128xf32>
    %cst_114 = arith.constant 6.000000e+00 : f32
    %206 = vector.broadcast %cst_114 : f32 to vector<8x128xf32>
    %207 = arith.addf %191, %206 : vector<8x128xf32>
    %208 = arith.mulf %205, %207 : vector<8x128xf32>
    %cst_115 = arith.constant 7.000000e+00 : f32
    %209 = vector.broadcast %cst_115 : f32 to vector<8x128xf32>
    %210 = arith.addf %191, %209 : vector<8x128xf32>
    %211 = arith.mulf %208, %210 : vector<8x128xf32>
    %212 = math.log %200 : vector<8x128xf32>
    %213 = math.log %211 : vector<8x128xf32>
    %214 = arith.addf %212, %213 : vector<8x128xf32>
    %cst_116 = arith.constant 8.000000e+00 : f32
    %215 = vector.broadcast %cst_116 : f32 to vector<8x128xf32>
    %216 = arith.addf %191, %215 : vector<8x128xf32>
    %217 = tpu.reciprocal %216 {approx = true} : vector<8x128xf32> -> vector<8x128xf32>
    %218 = arith.mulf %217, %217 : vector<8x128xf32>
    %cst_117 = arith.constant 7.93650805E-4 : f32
    %219 = vector.broadcast %cst_117 : f32 to vector<8x128xf32>
    %220 = arith.mulf %218, %219 : vector<8x128xf32>
    %cst_118 = arith.constant 0.00277777785 : f32
    %221 = vector.broadcast %cst_118 : f32 to vector<8x128xf32>
    %222 = arith.subf %221, %220 : vector<8x128xf32>
    %223 = arith.mulf %218, %222 : vector<8x128xf32>
    %cst_119 = arith.constant 0.0833333358 : f32
    %224 = vector.broadcast %cst_119 : f32 to vector<8x128xf32>
    %225 = arith.subf %224, %223 : vector<8x128xf32>
    %226 = arith.mulf %217, %225 : vector<8x128xf32>
    %cst_120 = arith.constant 5.000000e-01 : f32
    %227 = vector.broadcast %cst_120 : f32 to vector<8x128xf32>
    %228 = arith.subf %216, %227 : vector<8x128xf32>
    %229 = math.log %216 : vector<8x128xf32>
    %230 = arith.mulf %228, %229 : vector<8x128xf32>
    %231 = arith.subf %230, %216 : vector<8x128xf32>
    %cst_121 = arith.constant 0.918938517 : f32
    %232 = vector.broadcast %cst_121 : f32 to vector<8x128xf32>
    %233 = arith.addf %231, %232 : vector<8x128xf32>
    %234 = arith.addf %233, %226 : vector<8x128xf32>
    %235 = arith.subf %234, %214 : vector<8x128xf32>
    %236 = arith.addf %189, %235 : vector<8x128xf32>
    %237 = vector.broadcast %174 : vector<1x128xf32> to vector<8x128xf32>
    %238 = arith.subf %236, %237 : vector<8x128xf32>
    %cst_122 = arith.constant 1.000000e+00 : f32
    %239 = vector.broadcast %cst_122 : f32 to vector<8x128xf32>
    %240 = arith.addf %0, %239 : vector<8x128xf32>
    %cst_123 = arith.constant 1.000000e+00 : f32
    %241 = vector.broadcast %cst_123 : f32 to vector<8x128xf32>
    %242 = arith.addf %240, %241 : vector<8x128xf32>
    %243 = arith.mulf %240, %242 : vector<8x128xf32>
    %cst_124 = arith.constant 2.000000e+00 : f32
    %244 = vector.broadcast %cst_124 : f32 to vector<8x128xf32>
    %245 = arith.addf %240, %244 : vector<8x128xf32>
    %246 = arith.mulf %243, %245 : vector<8x128xf32>
    %cst_125 = arith.constant 3.000000e+00 : f32
    %247 = vector.broadcast %cst_125 : f32 to vector<8x128xf32>
    %248 = arith.addf %240, %247 : vector<8x128xf32>
    %249 = arith.mulf %246, %248 : vector<8x128xf32>
    %cst_126 = arith.constant 4.000000e+00 : f32
    %250 = vector.broadcast %cst_126 : f32 to vector<8x128xf32>
    %251 = arith.addf %240, %250 : vector<8x128xf32>
    %cst_127 = arith.constant 5.000000e+00 : f32
    %252 = vector.broadcast %cst_127 : f32 to vector<8x128xf32>
    %253 = arith.addf %240, %252 : vector<8x128xf32>
    %254 = arith.mulf %251, %253 : vector<8x128xf32>
    %cst_128 = arith.constant 6.000000e+00 : f32
    %255 = vector.broadcast %cst_128 : f32 to vector<8x128xf32>
    %256 = arith.addf %240, %255 : vector<8x128xf32>
    %257 = arith.mulf %254, %256 : vector<8x128xf32>
    %cst_129 = arith.constant 7.000000e+00 : f32
    %258 = vector.broadcast %cst_129 : f32 to vector<8x128xf32>
    %259 = arith.addf %240, %258 : vector<8x128xf32>
    %260 = arith.mulf %257, %259 : vector<8x128xf32>
    %261 = math.log %249 : vector<8x128xf32>
    %262 = math.log %260 : vector<8x128xf32>
    %263 = arith.addf %261, %262 : vector<8x128xf32>
    %cst_130 = arith.constant 8.000000e+00 : f32
    %264 = vector.broadcast %cst_130 : f32 to vector<8x128xf32>
    %265 = arith.addf %240, %264 : vector<8x128xf32>
    %266 = tpu.reciprocal %265 {approx = true} : vector<8x128xf32> -> vector<8x128xf32>
    %267 = arith.mulf %266, %266 : vector<8x128xf32>
    %cst_131 = arith.constant 7.93650805E-4 : f32
    %268 = vector.broadcast %cst_131 : f32 to vector<8x128xf32>
    %269 = arith.mulf %267, %268 : vector<8x128xf32>
    %cst_132 = arith.constant 0.00277777785 : f32
    %270 = vector.broadcast %cst_132 : f32 to vector<8x128xf32>
    %271 = arith.subf %270, %269 : vector<8x128xf32>
    %272 = arith.mulf %267, %271 : vector<8x128xf32>
    %cst_133 = arith.constant 0.0833333358 : f32
    %273 = vector.broadcast %cst_133 : f32 to vector<8x128xf32>
    %274 = arith.subf %273, %272 : vector<8x128xf32>
    %275 = arith.mulf %266, %274 : vector<8x128xf32>
    %cst_134 = arith.constant 5.000000e-01 : f32
    %276 = vector.broadcast %cst_134 : f32 to vector<8x128xf32>
    %277 = arith.subf %265, %276 : vector<8x128xf32>
    %278 = math.log %265 : vector<8x128xf32>
    %279 = arith.mulf %277, %278 : vector<8x128xf32>
    %280 = arith.subf %279, %265 : vector<8x128xf32>
    %cst_135 = arith.constant 0.918938517 : f32
    %281 = vector.broadcast %cst_135 : f32 to vector<8x128xf32>
    %282 = arith.addf %280, %281 : vector<8x128xf32>
    %283 = arith.addf %282, %275 : vector<8x128xf32>
    %284 = arith.subf %283, %263 : vector<8x128xf32>
    %285 = arith.subf %238, %284 : vector<8x128xf32>
    %cst_136 = arith.constant dense<0.000000e+00> : vector<8xf32>
    %286 = vector.multi_reduction <add>, %285, %cst_136 [1] : vector<8x128xf32> to vector<8xf32>
    %287 = vector.shape_cast %286 : vector<8xf32> to vector<8x1xf32>
    %cst_137 = arith.constant 0.000000e+00 : f32
    %288 = vector.broadcast %cst_137 : f32 to vector<8x1xf32>
    %289 = arith.subf %288, %287 : vector<8x1xf32>
    %c0_138 = arith.constant 0 : index
    %c0_139 = arith.constant 0 : index
    %290 = vector.load %arg32[%c0_138, %c0_139] : memref<1x32xf32, #tpu.memory_space<vmem>>, vector<1x32xf32>
    %291 = math.exp %290 : vector<1x32xf32>
    %cst_140 = arith.constant 9.99999993E-9 : f32
    %292 = vector.broadcast %cst_140 : f32 to vector<1x32xf32>
    %293 = arith.addf %291, %292 : vector<1x32xf32>
    %294 = math.log %293 : vector<1x32xf32>
    %cst_141 = arith.constant 1.000000e+00 : f32
    %295 = vector.broadcast %cst_141 : f32 to vector<1x32xf32>
    %296 = arith.addf %291, %295 : vector<1x32xf32>
    %297 = arith.mulf %291, %296 : vector<1x32xf32>
    %cst_142 = arith.constant 2.000000e+00 : f32
    %298 = vector.broadcast %cst_142 : f32 to vector<1x32xf32>
    %299 = arith.addf %291, %298 : vector<1x32xf32>
    %300 = arith.mulf %297, %299 : vector<1x32xf32>
    %cst_143 = arith.constant 3.000000e+00 : f32
    %301 = vector.broadcast %cst_143 : f32 to vector<1x32xf32>
    %302 = arith.addf %291, %301 : vector<1x32xf32>
    %303 = arith.mulf %300, %302 : vector<1x32xf32>
    %cst_144 = arith.constant 4.000000e+00 : f32
    %304 = vector.broadcast %cst_144 : f32 to vector<1x32xf32>
    %305 = arith.addf %291, %304 : vector<1x32xf32>
    %cst_145 = arith.constant 5.000000e+00 : f32
    %306 = vector.broadcast %cst_145 : f32 to vector<1x32xf32>
    %307 = arith.addf %291, %306 : vector<1x32xf32>
    %308 = arith.mulf %305, %307 : vector<1x32xf32>
    %cst_146 = arith.constant 6.000000e+00 : f32
    %309 = vector.broadcast %cst_146 : f32 to vector<1x32xf32>
    %310 = arith.addf %291, %309 : vector<1x32xf32>
    %311 = arith.mulf %308, %310 : vector<1x32xf32>
    %cst_147 = arith.constant 7.000000e+00 : f32
    %312 = vector.broadcast %cst_147 : f32 to vector<1x32xf32>
    %313 = arith.addf %291, %312 : vector<1x32xf32>
    %314 = arith.mulf %311, %313 : vector<1x32xf32>
    %315 = math.log %303 : vector<1x32xf32>
    %316 = math.log %314 : vector<1x32xf32>
    %317 = arith.addf %315, %316 : vector<1x32xf32>
    %cst_148 = arith.constant 8.000000e+00 : f32
    %318 = vector.broadcast %cst_148 : f32 to vector<1x32xf32>
    %319 = arith.addf %291, %318 : vector<1x32xf32>
    %320 = tpu.reciprocal %319 {approx = true} : vector<1x32xf32> -> vector<1x32xf32>
    %321 = arith.mulf %320, %320 : vector<1x32xf32>
    %cst_149 = arith.constant 7.93650805E-4 : f32
    %322 = vector.broadcast %cst_149 : f32 to vector<1x32xf32>
    %323 = arith.mulf %321, %322 : vector<1x32xf32>
    %cst_150 = arith.constant 0.00277777785 : f32
    %324 = vector.broadcast %cst_150 : f32 to vector<1x32xf32>
    %325 = arith.subf %324, %323 : vector<1x32xf32>
    %326 = arith.mulf %321, %325 : vector<1x32xf32>
    %cst_151 = arith.constant 0.0833333358 : f32
    %327 = vector.broadcast %cst_151 : f32 to vector<1x32xf32>
    %328 = arith.subf %327, %326 : vector<1x32xf32>
    %329 = arith.mulf %320, %328 : vector<1x32xf32>
    %cst_152 = arith.constant 5.000000e-01 : f32
    %330 = vector.broadcast %cst_152 : f32 to vector<1x32xf32>
    %331 = arith.subf %319, %330 : vector<1x32xf32>
    %332 = math.log %319 : vector<1x32xf32>
    %333 = arith.mulf %331, %332 : vector<1x32xf32>
    %334 = arith.subf %333, %319 : vector<1x32xf32>
    %cst_153 = arith.constant 0.918938517 : f32
    %335 = vector.broadcast %cst_153 : f32 to vector<1x32xf32>
    %336 = arith.addf %334, %335 : vector<1x32xf32>
    %337 = arith.addf %336, %329 : vector<1x32xf32>
    %338 = arith.subf %337, %317 : vector<1x32xf32>
    %339 = vector.broadcast %291 : vector<1x32xf32> to vector<8x32xf32>
    %340 = arith.addf %1, %339 : vector<8x32xf32>
    %cst_154 = arith.constant 1.000000e+00 : f32
    %341 = vector.broadcast %cst_154 : f32 to vector<8x32xf32>
    %342 = arith.addf %340, %341 : vector<8x32xf32>
    %343 = arith.mulf %340, %342 : vector<8x32xf32>
    %cst_155 = arith.constant 2.000000e+00 : f32
    %344 = vector.broadcast %cst_155 : f32 to vector<8x32xf32>
    %345 = arith.addf %340, %344 : vector<8x32xf32>
    %346 = arith.mulf %343, %345 : vector<8x32xf32>
    %cst_156 = arith.constant 3.000000e+00 : f32
    %347 = vector.broadcast %cst_156 : f32 to vector<8x32xf32>
    %348 = arith.addf %340, %347 : vector<8x32xf32>
    %349 = arith.mulf %346, %348 : vector<8x32xf32>
    %cst_157 = arith.constant 4.000000e+00 : f32
    %350 = vector.broadcast %cst_157 : f32 to vector<8x32xf32>
    %351 = arith.addf %340, %350 : vector<8x32xf32>
    %cst_158 = arith.constant 5.000000e+00 : f32
    %352 = vector.broadcast %cst_158 : f32 to vector<8x32xf32>
    %353 = arith.addf %340, %352 : vector<8x32xf32>
    %354 = arith.mulf %351, %353 : vector<8x32xf32>
    %cst_159 = arith.constant 6.000000e+00 : f32
    %355 = vector.broadcast %cst_159 : f32 to vector<8x32xf32>
    %356 = arith.addf %340, %355 : vector<8x32xf32>
    %357 = arith.mulf %354, %356 : vector<8x32xf32>
    %cst_160 = arith.constant 7.000000e+00 : f32
    %358 = vector.broadcast %cst_160 : f32 to vector<8x32xf32>
    %359 = arith.addf %340, %358 : vector<8x32xf32>
    %360 = arith.mulf %357, %359 : vector<8x32xf32>
    %361 = math.log %349 : vector<8x32xf32>
    %362 = math.log %360 : vector<8x32xf32>
    %363 = arith.addf %361, %362 : vector<8x32xf32>
    %cst_161 = arith.constant 8.000000e+00 : f32
    %364 = vector.broadcast %cst_161 : f32 to vector<8x32xf32>
    %365 = arith.addf %340, %364 : vector<8x32xf32>
    %366 = tpu.reciprocal %365 {approx = true} : vector<8x32xf32> -> vector<8x32xf32>
    %367 = arith.mulf %366, %366 : vector<8x32xf32>
    %cst_162 = arith.constant 7.93650805E-4 : f32
    %368 = vector.broadcast %cst_162 : f32 to vector<8x32xf32>
    %369 = arith.mulf %367, %368 : vector<8x32xf32>
    %cst_163 = arith.constant 0.00277777785 : f32
    %370 = vector.broadcast %cst_163 : f32 to vector<8x32xf32>
    %371 = arith.subf %370, %369 : vector<8x32xf32>
    %372 = arith.mulf %367, %371 : vector<8x32xf32>
    %cst_164 = arith.constant 0.0833333358 : f32
    %373 = vector.broadcast %cst_164 : f32 to vector<8x32xf32>
    %374 = arith.subf %373, %372 : vector<8x32xf32>
    %375 = arith.mulf %366, %374 : vector<8x32xf32>
    %cst_165 = arith.constant 5.000000e-01 : f32
    %376 = vector.broadcast %cst_165 : f32 to vector<8x32xf32>
    %377 = arith.subf %365, %376 : vector<8x32xf32>
    %378 = math.log %365 : vector<8x32xf32>
    %379 = arith.mulf %377, %378 : vector<8x32xf32>
    %380 = arith.subf %379, %365 : vector<8x32xf32>
    %cst_166 = arith.constant 0.918938517 : f32
    %381 = vector.broadcast %cst_166 : f32 to vector<8x32xf32>
    %382 = arith.addf %380, %381 : vector<8x32xf32>
    %383 = arith.addf %382, %375 : vector<8x32xf32>
    %384 = arith.subf %383, %363 : vector<8x32xf32>
    %cst_167 = arith.constant 1.000000e+00 : f32
    %385 = vector.broadcast %cst_167 : f32 to vector<8x32xf32>
    %386 = arith.addf %1, %385 : vector<8x32xf32>
    %cst_168 = arith.constant 1.000000e+00 : f32
    %387 = vector.broadcast %cst_168 : f32 to vector<8x32xf32>
    %388 = arith.addf %386, %387 : vector<8x32xf32>
    %389 = arith.mulf %386, %388 : vector<8x32xf32>
    %cst_169 = arith.constant 2.000000e+00 : f32
    %390 = vector.broadcast %cst_169 : f32 to vector<8x32xf32>
    %391 = arith.addf %386, %390 : vector<8x32xf32>
    %392 = arith.mulf %389, %391 : vector<8x32xf32>
    %cst_170 = arith.constant 3.000000e+00 : f32
    %393 = vector.broadcast %cst_170 : f32 to vector<8x32xf32>
    %394 = arith.addf %386, %393 : vector<8x32xf32>
    %395 = arith.mulf %392, %394 : vector<8x32xf32>
    %cst_171 = arith.constant 4.000000e+00 : f32
    %396 = vector.broadcast %cst_171 : f32 to vector<8x32xf32>
    %397 = arith.addf %386, %396 : vector<8x32xf32>
    %cst_172 = arith.constant 5.000000e+00 : f32
    %398 = vector.broadcast %cst_172 : f32 to vector<8x32xf32>
    %399 = arith.addf %386, %398 : vector<8x32xf32>
    %400 = arith.mulf %397, %399 : vector<8x32xf32>
    %cst_173 = arith.constant 6.000000e+00 : f32
    %401 = vector.broadcast %cst_173 : f32 to vector<8x32xf32>
    %402 = arith.addf %386, %401 : vector<8x32xf32>
    %403 = arith.mulf %400, %402 : vector<8x32xf32>
    %cst_174 = arith.constant 7.000000e+00 : f32
    %404 = vector.broadcast %cst_174 : f32 to vector<8x32xf32>
    %405 = arith.addf %386, %404 : vector<8x32xf32>
    %406 = arith.mulf %403, %405 : vector<8x32xf32>
    %407 = math.log %395 : vector<8x32xf32>
    %408 = math.log %406 : vector<8x32xf32>
    %409 = arith.addf %407, %408 : vector<8x32xf32>
    %cst_175 = arith.constant 8.000000e+00 : f32
    %410 = vector.broadcast %cst_175 : f32 to vector<8x32xf32>
    %411 = arith.addf %386, %410 : vector<8x32xf32>
    %412 = tpu.reciprocal %411 {approx = true} : vector<8x32xf32> -> vector<8x32xf32>
    %413 = arith.mulf %412, %412 : vector<8x32xf32>
    %cst_176 = arith.constant 7.93650805E-4 : f32
    %414 = vector.broadcast %cst_176 : f32 to vector<8x32xf32>
    %415 = arith.mulf %413, %414 : vector<8x32xf32>
    %cst_177 = arith.constant 0.00277777785 : f32
    %416 = vector.broadcast %cst_177 : f32 to vector<8x32xf32>
    %417 = arith.subf %416, %415 : vector<8x32xf32>
    %418 = arith.mulf %413, %417 : vector<8x32xf32>
    %cst_178 = arith.constant 0.0833333358 : f32
    %419 = vector.broadcast %cst_178 : f32 to vector<8x32xf32>
    %420 = arith.subf %419, %418 : vector<8x32xf32>
    %421 = arith.mulf %412, %420 : vector<8x32xf32>
    %cst_179 = arith.constant 5.000000e-01 : f32
    %422 = vector.broadcast %cst_179 : f32 to vector<8x32xf32>
    %423 = arith.subf %411, %422 : vector<8x32xf32>
    %424 = math.log %411 : vector<8x32xf32>
    %425 = arith.mulf %423, %424 : vector<8x32xf32>
    %426 = arith.subf %425, %411 : vector<8x32xf32>
    %cst_180 = arith.constant 0.918938517 : f32
    %427 = vector.broadcast %cst_180 : f32 to vector<8x32xf32>
    %428 = arith.addf %426, %427 : vector<8x32xf32>
    %429 = arith.addf %428, %421 : vector<8x32xf32>
    %430 = arith.subf %429, %409 : vector<8x32xf32>
    %431 = vector.broadcast %291 : vector<1x32xf32> to vector<8x32xf32>
    %432 = arith.addf %431, %88 : vector<8x32xf32>
    %cst_181 = arith.constant 9.99999993E-9 : f32
    %433 = vector.broadcast %cst_181 : f32 to vector<8x32xf32>
    %434 = arith.addf %432, %433 : vector<8x32xf32>
    %435 = math.log %434 : vector<8x32xf32>
    %436 = vector.broadcast %291 : vector<1x32xf32> to vector<8x32xf32>
    %437 = arith.addf %436, %110 : vector<8x32xf32>
    %cst_182 = arith.constant 9.99999993E-9 : f32
    %438 = vector.broadcast %cst_182 : f32 to vector<8x32xf32>
    %439 = arith.addf %437, %438 : vector<8x32xf32>
    %440 = math.log %439 : vector<8x32xf32>
    %441 = vector.broadcast %294 : vector<1x32xf32> to vector<8x32xf32>
    %442 = arith.subf %441, %435 : vector<8x32xf32>
    %443 = vector.broadcast %291 : vector<1x32xf32> to vector<8x32xf32>
    %444 = arith.mulf %443, %442 : vector<8x32xf32>
    %cst_183 = arith.constant 9.99999993E-9 : f32
    %445 = vector.broadcast %cst_183 : f32 to vector<8x32xf32>
    %446 = arith.addf %88, %445 : vector<8x32xf32>
    %447 = math.log %446 : vector<8x32xf32>
    %448 = arith.subf %447, %435 : vector<8x32xf32>
    %449 = arith.mulf %1, %448 : vector<8x32xf32>
    %450 = arith.addf %444, %449 : vector<8x32xf32>
    %451 = arith.addf %450, %384 : vector<8x32xf32>
    %452 = vector.broadcast %338 : vector<1x32xf32> to vector<8x32xf32>
    %453 = arith.subf %451, %452 : vector<8x32xf32>
    %454 = arith.subf %453, %430 : vector<8x32xf32>
    %455 = vector.broadcast %294 : vector<1x32xf32> to vector<8x32xf32>
    %456 = arith.subf %455, %440 : vector<8x32xf32>
    %457 = vector.broadcast %291 : vector<1x32xf32> to vector<8x32xf32>
    %458 = arith.mulf %457, %456 : vector<8x32xf32>
    %cst_184 = arith.constant 9.99999993E-9 : f32
    %459 = vector.broadcast %cst_184 : f32 to vector<8x32xf32>
    %460 = arith.addf %110, %459 : vector<8x32xf32>
    %461 = math.log %460 : vector<8x32xf32>
    %462 = arith.subf %461, %440 : vector<8x32xf32>
    %463 = arith.mulf %1, %462 : vector<8x32xf32>
    %464 = arith.addf %458, %463 : vector<8x32xf32>
    %465 = arith.addf %464, %384 : vector<8x32xf32>
    %466 = vector.broadcast %338 : vector<1x32xf32> to vector<8x32xf32>
    %467 = arith.subf %465, %466 : vector<8x32xf32>
    %468 = arith.subf %467, %430 : vector<8x32xf32>
    %469 = arith.subf %468, %125 : vector<8x32xf32>
    %470 = arith.maximumf %454, %469 : vector<8x32xf32>
    %471 = arith.subf %454, %470 : vector<8x32xf32>
    %472 = math.exp %471 : vector<8x32xf32>
    %473 = arith.subf %469, %470 : vector<8x32xf32>
    %474 = math.exp %473 : vector<8x32xf32>
    %475 = arith.addf %472, %474 : vector<8x32xf32>
    %476 = math.log %475 : vector<8x32xf32>
    %477 = arith.addf %470, %476 : vector<8x32xf32>
    %cst_185 = arith.constant 0.000000e+00 : f32
    %478 = vector.broadcast %cst_185 : f32 to vector<8x32xf32>
    %479 = arith.subf %478, %125 : vector<8x32xf32>
    %cst_186 = arith.constant 0.000000e+00 : f32
    %480 = vector.broadcast %cst_186 : f32 to vector<8x32xf32>
    %481 = arith.maximumf %479, %480 : vector<8x32xf32>
    %482 = math.absf %125 : vector<8x32xf32>
    %cst_187 = arith.constant 0.000000e+00 : f32
    %483 = vector.broadcast %cst_187 : f32 to vector<8x32xf32>
    %484 = arith.subf %483, %482 : vector<8x32xf32>
    %485 = math.exp %484 : vector<8x32xf32>
    %cst_188 = arith.constant 1.000000e+00 : f32
    %486 = vector.broadcast %cst_188 : f32 to vector<8x32xf32>
    %487 = arith.addf %486, %485 : vector<8x32xf32>
    %488 = math.log %487 : vector<8x32xf32>
    %489 = arith.addf %481, %488 : vector<8x32xf32>
    %490 = arith.subf %477, %489 : vector<8x32xf32>
    %cst_189 = arith.constant dense<0.000000e+00> : vector<8xf32>
    %491 = vector.multi_reduction <add>, %490, %cst_189 [1] : vector<8x32xf32> to vector<8xf32>
    %492 = vector.shape_cast %491 : vector<8xf32> to vector<8x1xf32>
    %cst_190 = arith.constant 0.000000e+00 : f32
    %493 = vector.broadcast %cst_190 : f32 to vector<8x1xf32>
    %494 = arith.subf %493, %492 : vector<8x1xf32>
    %495 = arith.mulf %32, %32 : vector<8x8xf32>
    %496 = arith.addf %36, %495 : vector<8x8xf32>
    %cst_191 = arith.constant 1.000000e+00 : f32
    %497 = vector.broadcast %cst_191 : f32 to vector<8x8xf32>
    %498 = arith.subf %496, %497 : vector<8x8xf32>
    %499 = math.log %36 : vector<8x8xf32>
    %500 = arith.subf %498, %499 : vector<8x8xf32>
    %cst_192 = arith.constant 5.000000e-01 : f32
    %501 = vector.broadcast %cst_192 : f32 to vector<8x8xf32>
    %502 = arith.mulf %501, %500 : vector<8x8xf32>
    %cst_193 = arith.constant dense<0.000000e+00> : vector<8xf32>
    %503 = vector.multi_reduction <add>, %502, %cst_193 [1] : vector<8x8xf32> to vector<8xf32>
    %504 = vector.shape_cast %503 : vector<8xf32> to vector<8x1xf32>
    %c0_194 = arith.constant 0 : index
    %c0_195 = arith.constant 0 : index
    %505 = vector.load %arg33[%c0_194, %c0_195] : memref<1x32xf32, #tpu.memory_space<vmem>>, vector<1x32xf32>
    %c0_196 = arith.constant 0 : index
    %c0_197 = arith.constant 0 : index
    %506 = vector.load %arg34[%c0_196, %c0_197] : memref<1x32xf32, #tpu.memory_space<vmem>>, vector<1x32xf32>
    %cst_198 = arith.constant 0.000000e+00 : f32
    %507 = vector.broadcast %cst_198 : f32 to vector<1x32xf32>
    %508 = arith.subf %507, %506 : vector<1x32xf32>
    %509 = math.exp %508 : vector<1x32xf32>
    %510 = vector.broadcast %509 : vector<1x32xf32> to vector<8x32xf32>
    %511 = arith.mulf %84, %510 : vector<8x32xf32>
    %512 = arith.mulf %511, %511 : vector<8x32xf32>
    %513 = vector.broadcast %505 : vector<1x32xf32> to vector<8x32xf32>
    %514 = arith.subf %82, %513 : vector<8x32xf32>
    %515 = vector.broadcast %509 : vector<1x32xf32> to vector<8x32xf32>
    %516 = arith.mulf %514, %515 : vector<8x32xf32>
    %517 = arith.mulf %516, %516 : vector<8x32xf32>
    %518 = arith.addf %512, %517 : vector<8x32xf32>
    %cst_199 = arith.constant 1.000000e+00 : f32
    %519 = vector.broadcast %cst_199 : f32 to vector<8x32xf32>
    %520 = arith.subf %518, %519 : vector<8x32xf32>
    %521 = math.log %512 : vector<8x32xf32>
    %522 = arith.subf %520, %521 : vector<8x32xf32>
    %cst_200 = arith.constant 5.000000e-01 : f32
    %523 = vector.broadcast %cst_200 : f32 to vector<8x32xf32>
    %524 = arith.mulf %523, %522 : vector<8x32xf32>
    %cst_201 = arith.constant dense<0.000000e+00> : vector<8xf32>
    %525 = vector.multi_reduction <add>, %524, %cst_201 [1] : vector<8x32xf32> to vector<8xf32>
    %526 = vector.shape_cast %525 : vector<8xf32> to vector<8x1xf32>
    %527 = tpu.iota {dimensions = array<i32: 1>} : vector<8x128xi32>
    %c0_i32 = arith.constant 0 : i32
    %528 = vector.broadcast %c0_i32 : i32 to vector<8x128xi32>
    %529 = arith.cmpi eq, %527, %528 : vector<8x128xi32>
    %cst_202 = arith.constant 0.000000e+00 : f32
    %530 = vector.shape_cast %289 : vector<8x1xf32> to vector<8x1xf32>
    %531 = vector.broadcast %530 : vector<8x1xf32> to vector<8x128xf32>
    %532 = vector.broadcast %cst_202 : f32 to vector<8x128xf32>
    %533 = arith.select %529, %531, %532 : vector<8x128xi1>, vector<8x128xf32>
    %c1_i32 = arith.constant 1 : i32
    %534 = vector.broadcast %c1_i32 : i32 to vector<8x128xi32>
    %535 = arith.cmpi eq, %527, %534 : vector<8x128xi32>
    %cst_203 = arith.constant 0.000000e+00 : f32
    %536 = vector.shape_cast %494 : vector<8x1xf32> to vector<8x1xf32>
    %537 = vector.broadcast %536 : vector<8x1xf32> to vector<8x128xf32>
    %538 = vector.broadcast %cst_203 : f32 to vector<8x128xf32>
    %539 = arith.select %535, %537, %538 : vector<8x128xi1>, vector<8x128xf32>
    %540 = arith.addf %533, %539 : vector<8x128xf32>
    %c2_i32 = arith.constant 2 : i32
    %541 = vector.broadcast %c2_i32 : i32 to vector<8x128xi32>
    %542 = arith.cmpi eq, %527, %541 : vector<8x128xi32>
    %cst_204 = arith.constant 0.000000e+00 : f32
    %543 = vector.shape_cast %504 : vector<8x1xf32> to vector<8x1xf32>
    %544 = vector.broadcast %543 : vector<8x1xf32> to vector<8x128xf32>
    %545 = vector.broadcast %cst_204 : f32 to vector<8x128xf32>
    %546 = arith.select %542, %544, %545 : vector<8x128xi1>, vector<8x128xf32>
    %547 = arith.addf %540, %546 : vector<8x128xf32>
    %c3_i32 = arith.constant 3 : i32
    %548 = vector.broadcast %c3_i32 : i32 to vector<8x128xi32>
    %549 = arith.cmpi eq, %527, %548 : vector<8x128xi32>
    %cst_205 = arith.constant 0.000000e+00 : f32
    %550 = vector.shape_cast %526 : vector<8x1xf32> to vector<8x1xf32>
    %551 = vector.broadcast %550 : vector<8x1xf32> to vector<8x128xf32>
    %552 = vector.broadcast %cst_205 : f32 to vector<8x128xf32>
    %553 = arith.select %549, %551, %552 : vector<8x128xi1>, vector<8x128xf32>
    %554 = arith.addf %547, %553 : vector<8x128xf32>
    %c0_206 = arith.constant 0 : index
    %c0_207 = arith.constant 0 : index
    %555 = vector.load %arg35[%c0_206, %c0_207] : memref<8x128xf32, #tpu.memory_space<vmem>>, vector<8x128xf32>
    tpu.vector_store %arg35[%c0_206, %c0_207], %554 {strides = array<i32>} : memref<8x128xf32, #tpu.memory_space<vmem>>, vector<8x128xf32>,
    return
  }
}

</mosaic_0001>

<bundles_post_ra>
// kernel: _totalvae_forward_impl.1
= control target key start
LH: loop header
LB: loop body
LE: loop exit
PB: predicated region body
PF: predicated region fallthrough
CT: control target
= control target key end

     0   :  { %v2330_v0 = vmov 0.0   ;;  %s2331_s3 = smov 4   ;;  %s2332_s7 = smov 5   ;;  %vm2333_vm0 = vmmov 0   ;;  %vm176_vm1 = vcmask 261120   ;;  %vm527_vm4 = vcmask 64512   ;;  %s2812_s0 = inlined_call_operand.smem [shape: u32[36], index: -1, kind: input, shape index: {}] }
   0x1   :  { %2048 = vmatprep.subr.mxu1 %v2330_v0  ;;  %s2378_s6 = sld [smem:[%s2812_s0 + %s2331_s3]]   ;;  %2037 = vmatprep.subr.mxu0 %v2330_v0  ;;  %s2334_s11 = smov 1  }
   0x2   :  { %s1903_s10 = sld [smem:[%s2812_s0 + %s2332_s7]]   ;;  %2045 = vmatprep.mubr.msk.f32.mxu0 %vm2333_vm0, %v2330_v0  ;;  %2080 = vmatprep.mubr.msk.f32.mxu1 %vm2333_vm0, %v2330_v0  ;;  %s2335_s18 = smov 7  }
   0x3   :  { %s2391_s14 = sld [smem:[%s2812_s0 + %s2334_s11]]   ;;  %s2336_s22 = smov 6  }
   0x4   :  { %s2396_s17 = sld [smem:[%s2812_s0]]   ;;  %s2337_s26 = smov 9  }
   0x5   :  { %s1905_s21 = sld [smem:[%s2812_s0 + %s2335_s18]]   ;;  %s2338_s30 = smov 2  }
   0x6   :  { %s1904_s25 = sld [smem:[%s2812_s0 + %s2336_s22]]   ;;  %s2339_s4 = smov 8  }
   0x7   :  { %v171_v1 = vld [vmem:[%s2378_s6 + $0x78] sm:$0xff]  ;;  %v170_v2 = vld [vmem:[%s2378_s6 + $0x70] sm:$0xff]  ;;  %v169_v3 = vld [vmem:[%s2378_s6 + $0x68] sm:$0xff]  ;;  %s1907_s29 = sld [smem:[%s2812_s0 + %s2337_s26]]   ;;  %s2340_s8 = smov 11  }
   0x8   :  { %2049 = vmatpush3.msra.mxu1 %v171_v1  ;;  %v175_v4 = vld [vmem:[%s1903_s10 + $0x18] sm:$0xff]  ;;  %v168_v5 = vld [vmem:[%s2378_s6 + $0x60] sm:$0xff]  ;;  %v174_v6 = vld [vmem:[%s1903_s10 + $0x10] sm:$0xff]  ;;  %s1900_s3 = sld [smem:[%s2812_s0 + %s2338_s30]]   ;;  %s2341_s12 = smov 10  }
   0x9   :  { %2050 = vmatprep.subr.mxu1 %v2330_v0  ;;  %2038 = vmatpush3.msra.mxu0 %v175_v4  ;;  %v173_v7 = vld [vmem:[%s1903_s10 + $0x8] sm:$0xff]  ;;  %v167_v8 = vld [vmem:[%s2378_s6 + $0x58] sm:$0xff]  ;;  %v2408_v9 = vld [vmem:[%s2391_s14] sm:$0xff]  ;;  %s1906_s7 = sld [smem:[%s2812_s0 + %s2339_s4]]   ;;  %s2342_s18 = smov 14  }
   0xa   :  { %2051 = vmatpush3.msra.mxu1 %v170_v2  ;;  %2039 = vmatprep.subr.mxu0 %v2330_v0  ;;  %v172_v10 = vld [vmem:[%s1903_s10] sm:$0xff]  ;;  %v2412_v11 = vadd.f32 1.0, %v2408_v9  ;;  %v166_v13 = vld [vmem:[%s2378_s6 + $0x50] sm:$0xff]  ;;  %v165_v15 = vld [vmem:[%s2378_s6 + $0x48] sm:$0xff]  ;;  %s1909_s11 = sld [smem:[%s2812_s0 + %s2340_s8]]   ;;  %s2343_s22 = smov 120  }
   0xb   :  { %2052 = vmatprep.subr.mxu1 %v2330_v0  ;;  %2040 = vmatpush3.msra.mxu0 %v174_v6  ;;  %v2415_v12 = vld [vmem:[%s2396_s17] sm:$0xff]  ;;  %v163_v17 = vld [vmem:[%s2378_s6 + $0x38] sm:$0xff]  ;;  %v162_v18 = vld [vmem:[%s2378_s6 + $0x30] sm:$0xff]  ;;  %s1908_s16 = sld [smem:[%s2812_s0 + %s2341_s12]]   ;;  %s2344_s23 = smov 16  }
   0xc   :  { %2053 = vmatpush3.msra.mxu1 %v169_v3  ;;  %2041 = vmatprep.subr.mxu0 %v2330_v0  ;;  %v2420_v14 = vadd.f32 1.0, %v2415_v12  ;;  %2228 = vlog2.f32 %v2412_v11  ;;  %v164_v16 = vld [vmem:[%s2378_s6 + $0x40] sm:$0xff]  ;;  %v161_v19 = vld [vmem:[%s2378_s6 + $0x28] sm:$0xff]  ;;  %v159_v22 = vld [vmem:[%s2378_s6 + $0x18] sm:$0xff]  ;;  %s1914_s26 = sld [smem:[%s2812_s0 + %s2344_s23]]   ;;  %s2345_s27 = smov 13  }
   0xd   :  { %2054 = vmatprep.subr.mxu1 %v2330_v0  ;;  %2042 = vmatpush3.msra.mxu0 %v173_v7  ;;  %v160_v20 = vld [vmem:[%s2378_s6 + $0x20] sm:$0xff]  ;;  %v158_v24 = vld [vmem:[%s2378_s6 + $0x10] sm:$0xff]  ;;  %v157_v26 = vld [vmem:[%s2378_s6 + $0x8] sm:$0xff]  ;;  %s2513_s30 = sld [smem:[%s2812_s0 + %s2345_s27]]   ;;  %s2346_s1 = smov 19  }
   0xe   :  { %2055 = vmatpush3.msra.mxu1 %v168_v5  ;;  %2043 = vmatprep.subr.mxu0 %v2330_v0  ;;  %2230 = vlog2.f32 %v2420_v14  ;;  %v156_v27 = vld [vmem:[%s2378_s6] sm:$0xff]  ;;  %v332_v29 = vld [vmem:[%s1905_s21 + $0x18] sm:$0xff]  ;;  %v331_v30 = vld [vmem:[%s1905_s21 + $0x10] sm:$0xff]  ;;  %s1917_s5 = sld [smem:[%s2812_s0 + %s2346_s1]]   ;;  %s2347_s6 = smov 21  }
   0xf   :  { %2056 = vmatprep.subr.mxu1 %v2330_v0  ;;  %2044 = vmatpush3.msra.mxu0 %v172_v10  ;;  %v330_v31 = vld [vmem:[%s1905_s21 + $0x8] sm:$0xff]  ;;  %v329_v32 = vld [vmem:[%s1905_s21] sm:$0xff]  ;;  %v417_v41 = vld [vmem:[%s1907_s29 + $0x18] sm:$0xff]  ;;  %s1912_s21 = sld [smem:[%s2812_s0 + %s2342_s18]]   ;;  %s2348_s10 = smov 24  }
  0x10   :  { %2057 = vmatpush3.msra.mxu1 %v167_v8  ;;  %2083 = vmatprep.subr.mxu0 %v2330_v0  ;;  %v1935_v36 = vld [vmem:[%s1904_s25] ss:$0 sm:$0xff]  ;;  %v416_v42 = vld [vmem:[%s1907_s29 + $0x10] sm:$0xff]  ;;  %v415_v43 = vld [vmem:[%s1907_s29 + $0x8] sm:$0xff]  ;;  %s1919_s9 = sld [smem:[%s2812_s0 + %s2347_s6]]   ;;  %s2349_s15 = smov 26  }
  0x11   :  { %2058 = vmatprep.subr.mxu1 %v2330_v0  ;;  %v414_v44 = vld [vmem:[%s1907_s29] sm:$0xff]  ;;  %s1922_s13 = sld [smem:[%s2812_s0 + %s2348_s10]]   ;;  %s2350_s20 = smov 29  }
  0x12   :  { %2059 = vmatpush3.msra.mxu1 %v166_v13  ;;  %v508_v45 = vld [vmem:[%s1900_s3] sm:$0xff]  ;;  %s1924_s19 = sld [smem:[%s2812_s0 + %s2349_s15]]   ;;  %s2351_s25 = smov 3  }
  0x13   :  { %2060 = vmatprep.subr.mxu1 %v2330_v0  ;;  %510 = vrot.lane.b32.xlu0 %v508_v45, %s2339_s4  ;;  %v1936_v46 = vld [vmem:[%s1906_s7] ss:$0 sm:$0xff]  ;;  %v605_v7 = vld [vmem:[%s2513_s30 + $0x18] sm:$0xff]  ;;  %v604_v8 = vld [vmem:[%s2513_s30 + $0x10] sm:$0xff]  ;;  %s1927_s24 = sld [smem:[%s2812_s0 + %s2350_s20]]   ;;  %s2352_s29 = smov 32  }
  0x14   :  { %2061 = vmatpush3.msra.mxu1 %v165_v15  ;;  %v519_v51 = vld [vmem:[%s1909_s11] sm:$0xff]  ;;  %s1901_s28 = sld [smem:[%s2812_s0 + %s2351_s25]]   ;;  %s2353_s1 = smov 12  }
  0x15   :  { %2062 = vmatprep.subr.mxu1 %v2330_v0  ;;  %v1938_v52 = vld [vmem:[%s1908_s16] ss:$0 sm:$0xff]  ;;  %s2354_s6 = smov 18  }
  0x16   :  { %2063 = vmatpush3.msra.mxu1 %v164_v16  ;;  %v606_v59 = vld [vmem:[%s1912_s21] sm:$0xff]  ;;  %s1916_s8 = sld [smem:[%s2812_s0 + %s2354_s6]]  }
  0x17   :  { %2064 = vmatprep.subr.mxu1 %v2330_v0  ;;  %v768_v6 = vld [vmem:[%s1914_s26] sm:$0xff]  ;;  %s1930_s26 = sld [smem:[%s2812_s0 + %s2352_s29]]  }
  0x18   :  { %2065 = vmatpush3.msra.mxu1 %v163_v17  ;;  %v851_v10 = vld [vmem:[%s1917_s5] sm:$0xff]  ;;  %s1910_s5 = sld [smem:[%s2812_s0 + %s2353_s1]]   ;;  %s2366_s1 = smov 30  }
  0x19   :  { %2066 = vmatprep.subr.mxu1 %v2330_v0  ;;  %v2229_v21 = vpop.eup %2228  ;;  %v1018_v13 = vld [vmem:[%s1919_s9] sm:$0xff]  ;;  %s2355_s9 = smov 17  }
  0x1a   :  { %2067 = vmatpush3.msra.mxu1 %v162_v18  ;;  %v153_v23 = vmul.f32 0.6931472, %v2229_v21  ;;  %v1101_v15 = vld [vmem:[%s1922_s13] sm:$0xff]  ;;  %v603_v18 = vld [vmem:[%s2513_s30 + $0x8] sm:$0xff]  ;;  %s1915_s12 = sld [smem:[%s2812_s0 + %s2355_s9]]   ;;  %s2356_s13 = smov 23  }
  0x1b   :  { %2068 = vmatprep.subr.mxu1 %v2330_v0  ;;  %v2231_v25 = vpop.eup %2230  ;;  %v1257_v16 = vld [vmem:[%s1924_s19] sm:$0xff]  ;;  %s2584_s18 = sld [smem:[%s2812_s0 + %s2356_s13]]   ;;  %s2357_s19 = smov 22  }
  0x1c   :  { %2069 = vmatpush3.msra.mxu1 %v161_v19  ;;  %2046 = vmatmul.mubr.msk.f32.vlgmr.msra.gmra.mxu0 %vm176_vm1, %v153_v23  ;;  %v150_v28 = vmul.f32 0.6931472, %v2231_v25  ;;  %v1340_v17 = vld [vmem:[%s1927_s24] sm:$0xff]  ;;  %s1920_s23 = sld [smem:[%s2812_s0 + %s2357_s19]]   ;;  %s2358_s24 = smov 28  }
  0x1d   :  { %2070 = vmatprep.subr.mxu1 %v2330_v0  ;;  %2091 = vmatprep.mubr.msk.f32.mxu0 %vm2333_vm0, %v2330_v0  ;;  %v602_v19 = vld [vmem:[%s2513_s30] sm:$0xff]  ;;  %s2601_s27 = sld [smem:[%s2812_s0 + %s2358_s24]]  }
  0x1e   :  { %2071 = vmatpush3.msra.mxu1 %v160_v20  ;;  %2084 = vmatpush3.msra.mxu0 %v332_v29  ;;  %v1005_v20 = vld [vmem:[%s1901_s28] sm:$0xff]  ;;  %s2359_s28 = smov 27  }
  0x1f   :  { %2072 = vmatprep.subr.mxu1 %v2330_v0  ;;  %2085 = vmatprep.subr.mxu0 %v2330_v0  ;;  %v1940_v21 = vld [vmem:[%s1910_s5] ss:$0 sm:$0xff]  ;;  %s1925_s3 = sld [smem:[%s2812_s0 + %s2359_s28]]   ;;  %s2360_s5 = smov 34  }
  0x20   :  { %2073 = vmatpush3.msra.mxu1 %v159_v22  ;;  %2086 = vmatpush3.msra.mxu0 %v331_v30  ;;  %v1945_v29 = vld [vmem:[%s1915_s12] ss:$0 sm:$0xff]  ;;  %s1932_s30 = sld [smem:[%s2812_s0 + %s2360_s5]]   ;;  %s2362_s12 = smov 20  }
  0x21   :  { %2074 = vmatprep.subr.mxu1 %v2330_v0  ;;  %2087 = vmatprep.subr.mxu0 %v2330_v0  ;;  %v1098_v45 = vld [vmem:[%s2584_s18 + $0x8] sm:$0xff]  ;;  %s1918_s16 = sld [smem:[%s2812_s0 + %s2362_s12]]  }
  0x22   :  { %2075 = vmatpush3.msra.mxu1 %v158_v24  ;;  %2088 = vmatpush3.msra.mxu0 %v330_v31  ;;  %v849_v31 = vld [vmem:[%s1916_s8 + $0x10] sm:$0xff]  ;;  %s1928_s5 = sld [smem:[%s2812_s0 + %s2366_s1]]  }
  0x23   :  { %2076 = vmatprep.subr.mxu1 %v2330_v0  ;;  %2089 = vmatprep.subr.mxu0 %v2330_v0 }
  0x24   :  { %2077 = vmatpush3.msra.mxu1 %v157_v26  ;;  %2090 = vmatpush3.msra.mxu0 %v329_v32 }
  0x25   :  { %2078 = vmatprep.subr.mxu1 %v2330_v0  ;;  %2094 = vmatprep.subr.mxu0 %v2330_v0 }
  0x26   :  { %2079 = vmatpush3.msra.mxu1 %v156_v27  ;;  %1007 = vrot.lane.b32.xlu1 %v1005_v20, %s2352_s29 }
  0x27   :  { %2081 = vmatmul.mubr.f32.vlgmr.msra.gmra.mxu1 %v150_v28  ;;  %2105 = vmatprep.subr.mxu1 %v2330_v0  ;;  %v850_v28 = vld [vmem:[%s1916_s8 + $0x18] sm:$0xff] }
  0x28   :  { %2107 = vmatprep.mubr.msk.f32.mxu1 %vm2333_vm0, %v2330_v0  ;;  %2106 = vmatpush3.msra.mxu1 %v519_v51  ;;  %v1955_v51 = vld [vmem:[%s1925_s3] ss:$0 sm:$0xff] }
  0x29   :  { %2126 = vmatprep.subr.mxu1 %v2330_v0 }
  0x85   :  { %v511_v62 = vpop.permute.xlu0 %510 }
  0xdc   :  { %v246_v33 = vpop.f32.mrf.mxu0 }
  0xde   :  { %v2047_v34 = vpop.f32.mrf.mxu0 }
  0xdf   :  { %v848_v34 = vld [vmem:[%s1916_s8 + $0x8] sm:$0xff] }
  0xe7   :  { %v316_v35 = vpop.f32.mrf.mxu1 }
  0xe8   :  { %v317_v37 = vadd.f32 %v316_v35, %v246_v33 }
  0xe9   :  { %v2082_v38 = vpop.f32.mrf.mxu1 }
  0xea   :  { %v327_v39 = vadd.f32 %v1935_v36, %v317_v37  ;;  %v847_v36 = vld [vmem:[%s1916_s8] sm:$0xff]  ;;  %s2361_s8 = smov 15  }
  0xeb   :  { %s1913_s11 = sld [smem:[%s2812_s0 + %s2361_s8]]  }
  0xec   :  { %v328_v40 = vmax.f32 %v327_v39, 0.0  ;;  %v1100_v39 = vld [vmem:[%s2584_s18 + $0x18] sm:$0xff] }
  0xee   :  { %2092 = vmatmul.mubr.msk.f32.vlgmr.msra.gmra.mxu0 %vm176_vm1, %v328_v40  ;;  %v1950_v40 = vld [vmem:[%s1920_s23] ss:$0 sm:$0xff]  ;;  %s2364_s23 = smov 96  }
  0xef   :  { %2095 = vmatpush3.msra.mxu0 %v417_v41  ;;  %2102 = vmatprep.mubr.msk.f32.mxu0 %vm2333_vm0, %v2330_v0 }
  0xf0   :  { %2096 = vmatprep.subr.mxu0 %v2330_v0 }
  0xf1   :  { %2097 = vmatpush3.msra.mxu0 %v416_v42  ;;  %v1099_v42 = vld [vmem:[%s2584_s18 + $0x10] sm:$0xff] }
  0xf2   :  { %2098 = vmatprep.subr.mxu0 %v2330_v0 }
  0xf3   :  { %2099 = vmatpush3.msra.mxu0 %v415_v43 }
  0xf4   :  { %2100 = vmatprep.subr.mxu0 %v2330_v0 }
  0xf5   :  { %2101 = vmatpush3.msra.mxu0 %v414_v44 }
  0xf6   :  { %2110 = vmatprep.subr.mxu0 %v2330_v0 }
 0x1ae   :  { %v409_v47 = vpop.f32.mrf.mxu0 }
 0x1af   :  { %v410_v48 = vadd.f32 %v1936_v46, %v409_v47  ;;  %v1097_v47 = vld [vmem:[%s2584_s18] sm:$0xff]  ;;  %s2363_s18 = smov 33  }
 0x1b0   :  { %v2093_v49 = vpop.f32.mrf.mxu0  ;;  %s1931_s21 = sld [smem:[%s2812_s0 + %s2363_s18]]  }
 0x1b1   :  { %v413_v50 = vmax.f32 %v410_v48, 0.0 }
 0x1b3   :  { %2103 = vmatmul.mubr.msk.f32.vlgmr.msra.gmra.mxu0 %vm176_vm1, %v413_v50  ;;  %v1339_v50 = vld [vmem:[%s2601_s27 + $0x18] sm:$0xff] }
 0x1b4   :  { %2112 = vmatprep.mubr.msk.f32.mxu0 %vm2333_vm0, %v2330_v0  ;;  %2111 = vmatpush3.msra.mxu0 %v606_v59 }
 0x1b5   :  { %2115 = vmatprep.subr.mxu0 %v2330_v0 }
 0x273   :  { %v494_v53 = vpop.f32.mrf.mxu0 }
 0x274   :  { %v2491_v54 = vadd.f32 %v1938_v52, %v494_v53  ;;  %v1338_v53 = vld [vmem:[%s2601_s27 + $0x10] sm:$0xff] }
 0x275   :  { %v2104_v55 = vpop.f32.mrf.mxu0 }
 0x276   :  { %v498_v56 = vmul.f32 1.442695, %v2491_v54 }
 0x278   :  { %2232 = vpow2.f32 %v498_v56 }
 0x285   :  { %v2233_v57 = vpop.eup %2232 }
 0x286   :  { %v2494_v58 = vadd.f32 0.0001, %v2233_v57  ;;  %v1337_v57 = vld [vmem:[%s2601_s27 + $0x8] sm:$0xff] }
 0x288   :  { %2234 = vrsqrt.f32 %v2494_v58  ;;  %vm503_vm2 = vcmp.eq.f32.partialorder %v2494_v58, inf  ;;  %v506_v63 = vand.u32 2147483648, %v2494_v58  ;;  %vm505_vm3 = vcmp.eq.f32.partialorder %v2494_v58, 0.0 }
 0x295   :  { %v2235_v60 = vpop.eup %2234 }
 0x296   :  { %v502_v61 = vmul.f32 %v2235_v60, %v2494_v58  ;;  %v1336_v60 = vld [vmem:[%s2601_s27] sm:$0xff] }
 0x298   :  { %v504_v1 = vsel %vm503_vm2, %v2494_v58, %v502_v61 }
 0x299   :  { %v507_v2 = vsel %vm505_vm3, %v506_v63, %v504_v1  ;;  %v1840_v63 = vld [vmem:[%s1932_s30] sm:$0x1] }
 0x29a   :  { %v513_v3 = vmul.f32 %v511_v62, %v507_v2  ;;  %v1841_v1 = vsub.f32 0.0, %v1840_v63 }
 0x29c   :  { %515 = vrot.lane.b32.xlu0 %v513_v3, %s2343_s22  ;;  %v1842_v2 = vmul.f32 1.442695, %v1841_v1 }
 0x29e   :  { %2236 = vpow2.f32 %v1842_v2 }
 0x30e   :  { %v516_v4 = vpop.permute.xlu0 %515 }
 0x30f   :  { %v518_v5 = vadd.f32 %v516_v4, %v2491_v54  ;;  %v1944_v4 = vld [vmem:[%s1913_s11] ss:$0 sm:$0xff] }
 0x311   :  { %2108 = vmatmul.mubr.msk.f32.vlgmr.msra.gmra.mxu1 %vm527_vm4, %v518_v5  ;;  %2113 = vmatmul.mubr.msk.f32.vlgmr.msra.gmra.mxu0 %vm527_vm4, %v518_v5 }
 0x312   :  { %2127 = vmatpush3.msra.mxu1 %v768_v6  ;;  %2128 = vmatprep.mubr.msk.f32.mxu1 %vm2333_vm0, %v2330_v0 }
 0x313   :  { %2131 = vmatprep.subr.mxu1 %v2330_v0  ;;  %2116 = vmatpush3.msra.mxu0 %v605_v7 }
 0x314   :  { %2117 = vmatprep.subr.mxu0 %v2330_v0  ;;  %2123 = vmatprep.mubr.msk.f32.mxu0 %vm2333_vm0, %v2330_v0 }
 0x315   :  { %2129 = vmatmul.mubr.msk.f32.vlgmr.msra.gmra.mxu1 %vm527_vm4, %v518_v5  ;;  %2118 = vmatpush3.msra.mxu0 %v604_v8 }
 0x316   :  { %2132 = vmatpush3.msra.mxu1 %v851_v10  ;;  %2133 = vmatprep.mubr.msk.f32.mxu1 %vm2333_vm0, %v2330_v0 }
 0x317   :  { %2147 = vmatprep.subr.mxu1 %v2330_v0  ;;  %2119 = vmatprep.subr.mxu0 %v2330_v0 }
 0x318   :  { %2120 = vmatpush3.msra.mxu0 %v603_v18 }
 0x319   :  { %2134 = vmatmul.mubr.msk.f32.vlgmr.msra.gmra.mxu1 %vm527_vm4, %v518_v5  ;;  %2121 = vmatprep.subr.mxu0 %v2330_v0 }
 0x31a   :  { %2148 = vmatpush3.msra.mxu1 %v1018_v13  ;;  %2149 = vmatprep.mubr.msk.f32.mxu1 %vm2333_vm0, %v2330_v0  ;;  %v1949_v13 = vld [vmem:[%s1918_s16] ss:$0 sm:$0xff] }
 0x31b   :  { %2152 = vmatprep.subr.mxu1 %v2330_v0  ;;  %2122 = vmatpush3.msra.mxu0 %v602_v19  ;;  %v1967_v19 = vld [vmem:[%s1931_s21] ss:$0 sm:$0xff] }
 0x31c   :  { %2136 = vmatprep.subr.mxu0 %v2330_v0 }
 0x31d   :  { %2150 = vmatmul.mubr.msk.f32.vlgmr.msra.gmra.mxu1 %vm527_vm4, %v518_v5 }
 0x31e   :  { %2153 = vmatpush3.msra.mxu1 %v1101_v15  ;;  %2154 = vmatprep.mubr.msk.f32.mxu1 %vm2333_vm0, %v2330_v0 }
 0x31f   :  { %2168 = vmatprep.subr.mxu1 %v2330_v0 }
 0x321   :  { %2155 = vmatmul.mubr.msk.f32.vlgmr.msra.gmra.mxu1 %vm527_vm4, %v518_v5 }
 0x322   :  { %2169 = vmatpush3.msra.mxu1 %v1257_v16  ;;  %2170 = vmatprep.mubr.msk.f32.mxu1 %vm2333_vm0, %v2330_v0  ;;  %v2237_v16 = vpop.eup %2236 }
 0x323   :  { %2173 = vmatprep.subr.mxu1 %v2330_v0 }
 0x325   :  { %2171 = vmatmul.mubr.msk.f32.vlgmr.msra.gmra.mxu1 %vm527_vm4, %v518_v5 }
 0x326   :  { %2174 = vmatpush3.msra.mxu1 %v1340_v17  ;;  %2175 = vmatprep.mubr.msk.f32.mxu1 %vm2333_vm0, %v2330_v0 }
 0x329   :  { %2176 = vmatmul.mubr.msk.f32.vlgmr.msra.gmra.mxu1 %vm527_vm4, %v518_v5 }
 0x3d1   :  { %v597_v22 = vpop.f32.mrf.mxu1  ;;  %v2579_v23 = vpop.f32.mrf.mxu0 }
 0x3d2   :  { %v598_v24 = vadd.f32 %v1940_v21, %v597_v22 }
 0x3d3   :  { %v2109_v25 = vpop.f32.mrf.mxu1  ;;  %v2114_v26 = vpop.f32.mrf.mxu0 }
 0x3d4   :  { %v601_v27 = vmax.f32 %v598_v24, 0.0 }
 0x3d5   :  { %v842_v30 = vpop.f32.mrf.mxu1 }
 0x3d6   :  { %2124 = vmatmul.mubr.msk.f32.vlgmr.msra.gmra.mxu0 %vm176_vm1, %v601_v27  ;;  %v843_v33 = vadd.f32 %v1945_v29, %v842_v30  ;;  %v1008_v30 = vpop.permute.xlu1 %1007 }
 0x3d7   :  { %2137 = vmatpush3.msra.mxu0 %v850_v28  ;;  %v2130_v32 = vpop.f32.mrf.mxu1  ;;  %2144 = vmatprep.mubr.msk.f32.mxu0 %vm2333_vm0, %v2330_v0 }
 0x3d8   :  { %2138 = vmatprep.subr.mxu0 %v2330_v0  ;;  %v846_v38 = vmax.f32 %v843_v33, 0.0  ;;  %v1821_v33 = vmul.f32 %v2491_v54, %v2491_v54 }
 0x3d9   :  { %2139 = vmatpush3.msra.mxu0 %v849_v31  ;;  %v2593_v35 = vpop.f32.mrf.mxu1 }
 0x3da   :  { %2140 = vmatprep.subr.mxu0 %v2330_v0 }
 0x3db   :  { %2141 = vmatpush3.msra.mxu0 %v848_v34  ;;  %v2135_v37 = vpop.f32.mrf.mxu1  ;;  %v1637_v34 = vld [vmem:[%s1930_s26] sm:$0x1] }
 0x3dc   :  { %2142 = vmatprep.subr.mxu0 %v2330_v0 }
 0x3dd   :  { %2143 = vmatpush3.msra.mxu0 %v847_v36  ;;  %v1092_v41 = vpop.f32.mrf.mxu1 }
 0x3de   :  { %2145 = vmatmul.mubr.msk.f32.vlgmr.msra.gmra.mxu0 %vm176_vm1, %v846_v38  ;;  %2157 = vmatprep.subr.mxu0 %v2330_v0  ;;  %v1093_v44 = vadd.f32 %v1950_v40, %v1092_v41 }
 0x3df   :  { %2158 = vmatpush3.msra.mxu0 %v1100_v39  ;;  %v2151_v43 = vpop.f32.mrf.mxu1  ;;  %2165 = vmatprep.mubr.msk.f32.mxu0 %vm2333_vm0, %v2330_v0 }
 0x3e0   :  { %2159 = vmatprep.subr.mxu0 %v2330_v0  ;;  %v1096_v49 = vmax.f32 %v1093_v44, 0.0 }
 0x3e1   :  { %2160 = vmatpush3.msra.mxu0 %v1099_v42  ;;  %v2613_v46 = vpop.f32.mrf.mxu1 }
 0x3e2   :  { %2161 = vmatprep.subr.mxu0 %v2330_v0 }
 0x3e3   :  { %2162 = vmatpush3.msra.mxu0 %v1098_v45  ;;  %v2156_v48 = vpop.f32.mrf.mxu1 }
 0x3e4   :  { %2163 = vmatprep.subr.mxu0 %v2330_v0 }
 0x3e5   :  { %2164 = vmatpush3.msra.mxu0 %v1097_v47  ;;  %v1331_v52 = vpop.f32.mrf.mxu1 }
 0x3e6   :  { %2166 = vmatmul.mubr.msk.f32.vlgmr.msra.gmra.mxu0 %vm176_vm1, %v1096_v49  ;;  %2178 = vmatprep.subr.mxu0 %v2330_v0  ;;  %v1332_v56 = vadd.f32 %v1955_v51, %v1331_v52 }
 0x3e7   :  { %2179 = vmatpush3.msra.mxu0 %v1339_v50  ;;  %v2172_v55 = vpop.f32.mrf.mxu1  ;;  %2186 = vmatprep.mubr.msk.f32.mxu0 %vm2333_vm0, %v2330_v0 }
 0x3e8   :  { %2180 = vmatprep.subr.mxu0 %v2330_v0  ;;  %v1335_v62 = vmax.f32 %v1332_v56, 0.0 }
 0x3e9   :  { %2181 = vmatpush3.msra.mxu0 %v1338_v53  ;;  %v2626_v59 = vpop.f32.mrf.mxu1  ;;  %v2688_v53 = vadd.f32 8.0, %v2412_v11 }
 0x3ea   :  { %2182 = vmatprep.subr.mxu0 %v2330_v0 }
 0x3eb   :  { %2183 = vmatpush3.msra.mxu0 %v1337_v57  ;;  %v2177_v61 = vpop.f32.mrf.mxu1 }
 0x3ec   :  { %2184 = vmatprep.subr.mxu0 %v2330_v0  ;;  %v1533_v0 = vlaneseq }
 0x3ed   :  { %2185 = vmatpush3.msra.mxu0 %v1336_v60 }
 0x3ee   :  { %2187 = vmatmul.mubr.msk.f32.vlgmr.msra.gmra.mxu0 %vm176_vm1, %v1335_v62  ;;  %v1534_v8 = vshrl.u32 %v1533_v0, 7 }
 0x3f0   :  { %v2646_v15 = vsub.s32 0, %v1534_v8 }
 0x3f2   :  { %v1848_v21 = vrot.slane %v2237_v16, %v2646_v15 }
 0x496   :  { %v746_v3 = vpop.f32.mrf.mxu0 }
 0x497   :  { %v747_v5 = vadd.f32 %v746_v3, %v2579_v23 }
 0x498   :  { %v2125_v6 = vpop.f32.mrf.mxu0 }
 0x499   :  { %v757_v7 = vadd.f32 %v1944_v4, %v747_v5 }
 0x49b   :  { %758 = vmax.xlane.f32.xlu1 %v757_v7 }
 0x49e   :  { %v991_v10 = vpop.f32.mrf.mxu0 }
 0x49f   :  { %v992_v17 = vadd.f32 %v991_v10, %v2593_v35  ;;  %v1638_v35 = vmul.f32 1.442695, %v1637_v34  ;;  %v1718_v10 = vadd.f32 1.0, %v2412_v11 }
 0x4a0   :  { %v2146_v18 = vpop.f32.mrf.mxu0 }
 0x4a1   :  { %v1002_v20 = vadd.f32 %v1949_v13, %v992_v17 }
 0x4a3   :  { %v1003_v22 = vmul.f32 1.442695, %v1002_v20  ;;  %v1861_v23 = vsub.f32 %v1002_v20, %v1967_v19 }
 0x4a5   :  { %2238 = vpow2.f32 %v1003_v22  ;;  %v1862_v25 = vmul.f32 %v1861_v23, %v1848_v21  ;;  %v1725_v22 = vadd.f32 5.0, %v2412_v11 }
 0x4a6   :  { %v1241_v24 = vpop.f32.mrf.mxu0  ;;  %2240 = vpow2.f32 %v1638_v35  ;;  %v1727_v35 = vadd.f32 6.0, %v2412_v11 }
 0x4a7   :  { %v1863_v27 = vmul.f32 %v1862_v25, %v1862_v25  ;;  %v1242_v50 = vadd.f32 %v1241_v24, %v2613_v46 }
 0x4a8   :  { %v2167_v26 = vpop.f32.mrf.mxu0 }
 0x4ac   :  { %1865 = vrot.lane.b32.xlu1 %v1863_v27, %s2352_s29  ;;  %v1719_v27 = vmul.f32 %v1718_v10, %v2412_v11 }
 0x4ae   :  { %v2651_v28 = vpop.f32.mrf.mxu0 }
 0x4b0   :  { %v2188_v29 = vpop.f32.mrf.mxu0 }
 0x4b1   :  { %v1720_v29 = vadd.f32 2.0, %v2412_v11 }
 0x4b2   :  { %v2239_v31 = vpop.eup %2238 }
 0x4b3   :  { %v1010_v32 = vmul.f32 %v2239_v31, %v1008_v30  ;;  %v2662_v36 = vpop.eup %2240 }
 0x4b4   :  { %v2666_v37 = vrot.slane %v2662_v36, %v2646_v15  ;;  %v2671_v54 = vadd.f32 8.0, %v2662_v36  ;;  %v1643_v40 = vadd.f32 1.0, %v2662_v36  ;;  %v1649_v41 = vadd.f32 4.0, %v2662_v36 }
 0x4b5   :  { %1012 = vrot.lane.b32.xlu0 %v1010_v32, %s2364_s23  ;;  %v1645_v43 = vadd.f32 2.0, %v2662_v36  ;;  %v1652_v52 = vadd.f32 6.0, %v2662_v36  ;;  %v1647_v60 = vadd.f32 3.0, %v2662_v36  ;;  %v1654_v5 = vadd.f32 7.0, %v2662_v36 }
 0x4b6   :  { %v1683_v38 = vadd.f32 %v2666_v37, %v2408_v9  ;;  %2242 = vrcp.f32 %v2671_v54  ;;  %v1650_v9 = vadd.f32 5.0, %v2662_v36  ;;  %v1644_v42 = vmul.f32 %v2662_v36, %v1643_v40 }
 0x4b8   :  { %v2673_v39 = vadd.f32 8.0, %v1683_v38  ;;  %v1684_v45 = vadd.f32 1.0, %v1683_v38  ;;  %v1690_v48 = vadd.f32 4.0, %v1683_v38  ;;  %v1691_v49 = vadd.f32 5.0, %v1683_v38 }
 0x4b9   :  { %1850 = vrot.lane.b32.xlu0 %v1848_v21, %s2352_s29  ;;  %v1651_v51 = vmul.f32 %v1650_v9, %v1649_v41  ;;  %v1646_v57 = vmul.f32 %v1645_v43, %v1644_v42  ;;  %v1686_v1 = vadd.f32 2.0, %v1683_v38  ;;  %v1693_v2 = vadd.f32 6.0, %v1683_v38 }
 0x4ba   :  { %2244 = vrcp.f32 %v2673_v39  ;;  %v1685_v63 = vmul.f32 %v1684_v45, %v1683_v38  ;;  %v1692_v46 = vmul.f32 %v1691_v49, %v1690_v48  ;;  %v1688_v18 = vadd.f32 3.0, %v1683_v38 }
 0x4bb   :  { %2246 = vlog2.f32 %v2671_v54  ;;  %v1653_v4 = vmul.f32 %v1652_v52, %v1651_v51  ;;  %v1648_v8 = vmul.f32 %v1647_v60, %v1646_v57  ;;  %v1724_v21 = vadd.f32 4.0, %v2412_v11 }
 0x4bc   :  { %2248 = vlog2.f32 %v2673_v39  ;;  %v1687_v17 = vmul.f32 %v1686_v1, %v1685_v63  ;;  %v1694_v19 = vmul.f32 %v1693_v2, %v1692_v46  ;;  %v1721_v41 = vmul.f32 %v1720_v29, %v1719_v27 }
 0x4bd   :  { %1823 = vrot.lane.b32.xlu0 %v1821_v33, %s2339_s4  ;;  %s2365_s4 = smov 25   ;;  %v1655_v25 = vmul.f32 %v1654_v5, %v1653_v4  ;;  %v1726_v34 = vmul.f32 %v1725_v22, %v1724_v21  ;;  %v1722_v9 = vadd.f32 3.0, %v2412_v11  ;;  %v1729_v48 = vadd.f32 7.0, %v2412_v11 }
 0x4be   :  { %s1923_s28 = sld [smem:[%s2812_s0 + %s2365_s4]]   ;;  %v1964_v11 = vadd.f32 -0.5, %v2673_v39 }
 0x4bf   :  { %v1723_v52 = vmul.f32 %v1722_v9, %v1721_v41  ;;  %v1965_v9 = vadd.f32 -0.5, %v2688_v53 }
 0x4c3   :  { %v2696_v13 = vpop.eup %2242 }
 0x4c4   :  { %v1954_v61 = vld [vmem:[%s1923_s28] ss:$0 sm:$0xff]  ;;  %v1663_v26 = vmul.f32 %v2696_v13, %v2696_v13 }
 0x4c5   :  { %v1252_v6 = vadd.f32 %v1954_v61, %v1242_v50  ;;  %v1963_v50 = vadd.f32 -0.5, %v2671_v54 }
 0x4c6   :  { %v1664_v40 = vmul.f32 0.0007936508, %v1663_v26 }
 0x4c7   :  { %v2700_v23 = vpop.eup %2244  ;;  %v1253_v30 = vmax.f32 %v1252_v6, 0.0 }
 0x4c8   :  { %v1704_v33 = vmul.f32 %v2700_v23, %v2700_v23  ;;  %v2247_v42 = vpop.eup %2246 }
 0x4c9   :  { %v1254_v43 = vadd.f32 1.0, %v1253_v30  ;;  %v1671_v51 = vmul.f32 0.6931472, %v2247_v42 }
 0x4ca   :  { %v1705_v45 = vmul.f32 0.0007936508, %v1704_v33 }
 0x4cb   :  { %v1672_v5 = vmul.f32 %v1963_v50, %v1671_v51 }
 0x4cc   :  { %v1706_v61 = vsub.f32 0.0027777778, %v1705_v45 }
 0x4cd   :  { %v1673_v30 = vsub.f32 %v1672_v5, %v2671_v54 }
 0x524   :  { %v759_v44 = vpop.xlane.xlu1 %758 }
 0x525   :  { %v760_v47 = vsub.f32 %v757_v7, %v759_v44  ;;  %v2249_v44 = vpop.eup %2248 }
 0x527   :  { %v761_v55 = vmul.f32 1.442695, %v760_v47  ;;  %v1013_v56 = vpop.permute.xlu0 %1012  ;;  %v1728_v47 = vmul.f32 %v1727_v35, %v1726_v34 }
 0x528   :  { %v1015_v62 = vadd.f32 %v1013_v56, %v1002_v20  ;;  %v1695_v20 = vadd.f32 7.0, %v1683_v38  ;;  %v1640_v38 = vadd.f32 1e-08, %v2662_v36  ;;  %v1665_v36 = vsub.f32 0.0027777778, %v1664_v40  ;;  %v1866_v60 = vpop.permute.xlu1 %1865 }
 0x529   :  { %2250 = vpow2.f32 %v761_v55  ;;  %v1255_v56 = vadd.f32 1e-08, %v1254_v43  ;;  %v1730_v63 = vmul.f32 %v1729_v48, %v1728_v47 }
 0x52a   :  { %v1016_v3 = vmul.f32 1.442695, %v1015_v62  ;;  %2252 = vrcp.f32 %v2688_v53  ;;  %v1696_v32 = vmul.f32 %v1695_v20, %v1694_v19  ;;  %v1712_v62 = vmul.f32 0.6931472, %v2249_v44 }
 0x52b   :  { %v1851_v7 = vpop.permute.xlu0 %1850  ;;  %v1666_v4 = vmul.f32 %v1665_v36, %v1663_v26  ;;  %v1674_v44 = vadd.f32 0.9189385, %v1673_v30 }
 0x52c   :  { %2254 = vpow2.f32 %v1016_v3  ;;  %v1853_v16 = vmul.f32 %v2239_v31, %v1851_v7  ;;  %v1689_v31 = vmul.f32 %v1688_v18, %v1687_v17  ;;  %v1707_v18 = vmul.f32 %v1706_v61, %v1704_v33 }
 0x52d   :  { %2256 = vlog2.f32 %v1648_v8  ;;  %v1713_v19 = vmul.f32 %v1964_v11, %v1712_v62  ;;  %v1667_v29 = vsub.f32 0.083333336, %v1666_v4 }
 0x52e   :  { %v1854_v24 = vmul.f32 %v1853_v16, %v1853_v16 }
 0x52f   :  { %v1824_v26 = vpop.permute.xlu0 %1823  ;;  %v1714_v33 = vsub.f32 %v1713_v19, %v2673_v39  ;;  %v1668_v39 = vmul.f32 %v2696_v13, %v1667_v29 }
 0x530   :  { %2258 = vlog2.f32 %v1854_v24  ;;  %v1868_v1 = vadd.f32 %v1866_v60, %v1854_v24  ;;  %v1826_v40 = vadd.f32 %v1824_v26, %v2494_v58  ;;  %v1481_v60 = vadd.f32 %v2651_v28, %v2626_v59 }
 0x531   :  { %2260 = vlog2.f32 %v1655_v25  ;;  %v1715_v50 = vadd.f32 0.9189385, %v1714_v33 }
 0x532   :  { %2262 = vlog2.f32 %v2688_v53  ;;  %v1968_v20 = vadd.f32 -1.0, %v1868_v1 }
 0x533   :  { %2264 = vlog2.f32 %v1689_v31 }
 0x534   :  { %2266 = vlog2.f32 %v1696_v32  ;;  %v1708_v32 = vsub.f32 0.083333336, %v1707_v18 }
 0x535   :  { %2268 = vlog2.f32 %v1640_v38 }
 0x536   :  { %v2713_v49 = vpop.eup %2250  ;;  %2270 = vlog2.f32 %v2494_v58  ;;  %v1709_v36 = vmul.f32 %v2700_v23, %v1708_v32 }
 0x537   :  { %763 = vadd.xlane.f32.xlu0 %v2713_v49  ;;  %v2717_v55 = vpop.eup %2252  ;;  %2272 = vlog2.f32 %v1723_v52  ;;  %v1966_v52 = vadd.f32 -1.0, %v1826_v40 }
 0x538   :  { %v1738_v6 = vmul.f32 %v2717_v55, %v2717_v55  ;;  %v1716_v1 = vadd.f32 %v1715_v50, %v1709_v36 }
 0x539   :  { %v2255_v57 = vpop.eup %2254 }
 0x53a   :  { %v1256_v46 = vmul.f32 %v2255_v57, %v1255_v56  ;;  %v1752_v2 = vadd.f32 %v2255_v57, %v2666_v37  ;;  %v1768_v3 = vadd.f32 1e-08, %v2255_v57  ;;  %v2257_v7 = vpop.eup %2256  ;;  %v1739_v24 = vmul.f32 0.0007936508, %v1738_v6 }
 0x53b   :  { %154 = vadd.xlane.f32.xlu0 %v2415_v12  ;;  %v1657_v54 = vmul.f32 0.6931472, %v2257_v7 }
 0x53c   :  { %v1753_v8 = vadd.f32 1e-08, %v1752_v2  ;;  %v1756_v10 = vadd.f32 %v2666_v37, %v1256_v46  ;;  %2274 = vlog2.f32 %v1768_v3  ;;  %v1785_v16 = vadd.f32 1e-08, %v1256_v46  ;;  %v1959_v2 = vld [vmem:[%s1928_s5] ss:$0 sm:$0xff] }
 0x53d   :  { %v2259_v17 = vpop.eup %2258  ;;  %2276 = vlog2.f32 %v1730_v63  ;;  %v1740_v41 = vsub.f32 0.0027777778, %v1739_v24  ;;  %v1675_v63 = vadd.f32 %v1674_v44, %v1668_v39  ;;  %v1491_v28 = vadd.f32 %v1959_v2, %v1481_v60 }
 0x53e   :  { %v1871_v21 = vmul.f32 0.6931472, %v2259_v17  ;;  %2278 = vlog2.f32 %v1753_v8  ;;  %v1757_v12 = vadd.f32 1e-08, %v1756_v10  ;;  %v2261_v22 = vpop.eup %2260 }
 0x53f   :  { %2280 = vlog2.f32 %v1785_v16  ;;  %v2263_v25 = vpop.eup %2262  ;;  %v1659_v43 = vmul.f32 0.6931472, %v2261_v22  ;;  %v1741_v58 = vmul.f32 %v1740_v41, %v1738_v6  ;;  %v1808_v32 = vand.u32 2147483647, %v1491_v28 }
 0x540   :  { %v1872_v27 = vsub.f32 %v1968_v20, %v1871_v21  ;;  %2282 = vlog2.f32 %v1757_v12  ;;  %v2265_v31 = vpop.eup %2264  ;;  %v1746_v42 = vmul.f32 0.6931472, %v2263_v25 }
 0x541   :  { %v2267_v34 = vpop.eup %2266  ;;  %v1698_v47 = vmul.f32 0.6931472, %v2265_v31  ;;  %v1660_v62 = vadd.f32 %v1659_v43, %v1657_v54  ;;  %v1742_v5 = vsub.f32 0.083333336, %v1741_v58 }
 0x542   :  { %v1873_v35 = vmul.f32 0.5, %v1872_v27  ;;  %v2269_v38 = vpop.eup %2268  ;;  %v1700_v48 = vmul.f32 0.6931472, %v2267_v34  ;;  %v1747_v56 = vmul.f32 %v1965_v9, %v1746_v42  ;;  %v2328_v27 = vld [vmem:[%s2391_s14] sm:$0xff]  ;;  %v1809_v42 = vsub.f32 0.0, %v1808_v32  ;;  %s2367_s14 = smov 31  }
 0x543   :  { %v2271_v45 = vpop.eup %2270  ;;  %v1642_v51 = vmul.f32 0.6931472, %v2269_v38  ;;  %v1676_v16 = vsub.f32 %v1675_v63, %v1660_v62  ;;  %v1743_v25 = vmul.f32 %v2717_v55, %v1742_v5  ;;  %v1806_v63 = vsub.f32 0.0, %v1491_v28  ;;  %s1929_s7 = sld [smem:[%s2812_s0 + %s2367_s14]]  }
 0x544   :  { %1875 = vrot.lane.b32.xlu1 %v1873_v35, %s2364_s23  ;;  %v2273_v57 = vpop.eup %2272  ;;  %v1829_v61 = vmul.f32 0.6931472, %v2271_v45  ;;  %v1701_v13 = vadd.f32 %v1700_v48, %v1698_v47  ;;  %v1748_v6 = vsub.f32 %v1747_v56, %v2688_v53  ;;  %v1810_v45 = vmul.f32 1.442695, %v1809_v42 }
 0x545   :  { %v1764_v3 = vrot.slane %v1642_v51, %v2646_v15  ;;  %v1732_v18 = vmul.f32 0.6931472, %v2273_v57  ;;  %v1779_v38 = vrot.slane %v1676_v16, %v2646_v15  ;;  %v1807_v2 = vmax.f32 %v1806_v63, 0.0 }
 0x546   :  { %v1830_v4 = vsub.f32 %v1966_v52, %v1829_v61  ;;  %v1717_v17 = vsub.f32 %v1716_v1, %v1701_v13  ;;  %v1749_v26 = vadd.f32 0.9189385, %v1748_v6  ;;  %2284 = vpow2.f32 %v1810_v45 }
 0x547   :  { %v1610_v63 = vadd.f32 7.0, %v2420_v14 }
 0x548   :  { %v1831_v22 = vmul.f32 0.5, %v1830_v4  ;;  %v1750_v41 = vadd.f32 %v1749_v26, %v1743_v25 }
 0x549   :  { %v2275_v11 = vpop.eup %2274  ;;  %v1492_v6 = vld [vmem:[%s1929_s7] sm:$0x1] }
 0x54a   :  { %v2277_v46 = vpop.eup %2276  ;;  %v1770_v10 = vmul.f32 0.6931472, %v2275_v11 }
 0x54b   :  { %v2279_v23 = vpop.eup %2278  ;;  %v1734_v24 = vmul.f32 0.6931472, %v2277_v46 }
 0x54c   :  { %v2281_v7 = vpop.eup %2280  ;;  %v1755_v8 = vmul.f32 0.6931472, %v2279_v23 }
 0x54d   :  { %v2283_v59 = vpop.eup %2282  ;;  %v1787_v12 = vmul.f32 0.6931472, %v2281_v7  ;;  %v1735_v40 = vadd.f32 %v1734_v24, %v1732_v18  ;;  %v1493_v7 = vmul.f32 1.442695, %v1492_v6  ;;  %v2765_v18 = vadd.f32 8.0, %v2420_v14 }
 0x54e   :  { %v1759_v19 = vmul.f32 0.6931472, %v2283_v59  ;;  %v1766_v20 = vsub.f32 %v1764_v3, %v1755_v8  ;;  %v1771_v21 = vsub.f32 %v1770_v10, %v1755_v8  ;;  %v2754_v59 = vld [vmem:[%s2396_s17] sm:$0xff]  ;;  %s2368_s17 = smov 35  }
 0x54f   :  { %v1751_v43 = vsub.f32 %v1750_v41, %v1735_v40  ;;  %s1933_s9 = sld [smem:[%s2812_s0 + %s2368_s17]]  }
 0x550   :  { %v1767_v53 = vmul.f32 %v1766_v20, %v2666_v37  ;;  %v1772_v29 = vmul.f32 %v2328_v27, %v1771_v21  ;;  %v1783_v30 = vsub.f32 %v1764_v3, %v1759_v19  ;;  %v1788_v31 = vsub.f32 %v1787_v12, %v1759_v19 }
 0x551   :  { %1833 = vrot.lane.b32.xlu0 %v1831_v22, %s2343_s22 }
 0x552   :  { %v1773_v33 = vadd.f32 %v1772_v29, %v1767_v53  ;;  %v1784_v34 = vmul.f32 %v1783_v30, %v2666_v37  ;;  %v1789_v35 = vmul.f32 %v2328_v27, %v1788_v31  ;;  %v1599_v30 = vadd.f32 1.0, %v2420_v14 }
 0x553   :  { %v2285_v56 = vpop.eup %2284 }
 0x554   :  { %v1774_v9 = vadd.f32 %v1773_v33, %v1717_v17  ;;  %v1790_v55 = vadd.f32 %v1789_v35, %v1784_v34  ;;  %v1812_v57 = vadd.f32 1.0, %v2285_v56  ;;  %v1605_v35 = vadd.f32 4.0, %v2420_v14 }
 0x555   :  { %v1600_v42 = vmul.f32 %v1599_v30, %v2420_v14  ;;  %v1603_v56 = vadd.f32 3.0, %v2420_v14 }
 0x556   :  { %v1791_v54 = vadd.f32 %v1790_v55, %v1717_v17  ;;  %v1781_v39 = vsub.f32 %v1774_v9, %v1779_v38 }
 0x558   :  { %v1792_v44 = vsub.f32 %v1791_v54, %v1779_v38  ;;  %v1782_v48 = vsub.f32 %v1781_v39, %v1751_v43  ;;  %v1606_v38 = vadd.f32 5.0, %v2420_v14  ;;  %v1601_v54 = vadd.f32 2.0, %v2420_v14 }
 0x55a   :  { %v1793_v47 = vsub.f32 %v1792_v44, %v1751_v43 }
 0x55c   :  { %v1794_v36 = vsub.f32 %v1793_v47, %v1491_v28 }
 0x55e   :  { %v1795_v50 = vmax.f32 %v1782_v48, %v1794_v36 }
 0x560   :  { %v1796_v51 = vsub.f32 %v1782_v48, %v1795_v50  ;;  %v1799_v37 = vsub.f32 %v1794_v36, %v1795_v50  ;;  %v1607_v36 = vmul.f32 %v1606_v38, %v1605_v35 }
 0x562   :  { %v1797_v52 = vmul.f32 1.442695, %v1796_v51  ;;  %v1800_v58 = vmul.f32 1.442695, %v1799_v37 }
 0x564   :  { %2286 = vpow2.f32 %v1797_v52 }
 0x565   :  { %2288 = vpow2.f32 %v1800_v58  ;;  %v1602_v58 = vmul.f32 %v1601_v54, %v1600_v42 }
 0x566   :  { %2290 = vlog2.f32 %v1812_v57 }
 0x571   :  { %v2287_v60 = vpop.eup %2286 }
 0x572   :  { %v2289_v61 = vpop.eup %2288 }
 0x573   :  { %v1802_v11 = vadd.f32 %v2289_v61, %v2287_v60  ;;  %v2291_v62 = vpop.eup %2290 }
 0x574   :  { %v1814_v13 = vmul.f32 0.6931472, %v2291_v62 }
 0x575   :  { %2292 = vlog2.f32 %v1802_v11 }
 0x576   :  { %v1815_v23 = vadd.f32 %v1814_v13, %v1807_v2  ;;  %2294 = vpow2.f32 %v1493_v7 }
 0x582   :  { %v2293_v1 = vpop.eup %2292 }
 0x583   :  { %v1804_v46 = vmul.f32 0.6931472, %v2293_v1  ;;  %v2295_v8 = vpop.eup %2294 }
 0x584   :  { %v2751_v10 = vrot.slane %v2295_v8, %v2646_v15  ;;  %v2758_v16 = vadd.f32 8.0, %v2295_v8  ;;  %v1498_v19 = vadd.f32 1.0, %v2295_v8  ;;  %v1504_v20 = vadd.f32 4.0, %v2295_v8 }
 0x585   :  { %v1805_v3 = vadd.f32 %v1804_v46, %v1795_v50  ;;  %v1505_v21 = vadd.f32 5.0, %v2295_v8  ;;  %v1500_v53 = vadd.f32 2.0, %v2295_v8  ;;  %v1507_v29 = vadd.f32 6.0, %v2295_v8 }
 0x586   :  { %v1556_v28 = vadd.f32 %v2754_v59, %v2751_v10  ;;  %2296 = vrcp.f32 %v2758_v16  ;;  %v1499_v26 = vmul.f32 %v2295_v8, %v1498_v19  ;;  %v1502_v41 = vadd.f32 3.0, %v2295_v8 }
 0x587   :  { %v1816_v4 = vsub.f32 %v1805_v3, %v1815_v23  ;;  %v1506_v27 = vmul.f32 %v1505_v21, %v1504_v20  ;;  %v1509_v55 = vadd.f32 7.0, %v2295_v8  ;;  %v1495_v43 = vadd.f32 1e-08, %v2295_v8 }
 0x588   :  { %v2760_v17 = vadd.f32 8.0, %v1556_v28  ;;  %v1557_v12 = vadd.f32 1.0, %v1556_v28  ;;  %v1563_v22 = vadd.f32 4.0, %v1556_v28  ;;  %v1564_v24 = vadd.f32 5.0, %v1556_v28 }
 0x589   :  { %v1817_v5 = vsel %vm176_vm1, %v1816_v4, 0.0  ;;  %v1559_v32 = vadd.f32 2.0, %v1556_v28  ;;  %v1566_v34 = vadd.f32 6.0, %v1556_v28  ;;  %v1501_v40 = vmul.f32 %v1500_v53, %v1499_v26 }
 0x58a   :  { %1818 = vadd.xlane.f32.xlu0 %v1817_v5  ;;  %2298 = vrcp.f32 %v2760_v17  ;;  %v1558_v31 = vmul.f32 %v1557_v12, %v1556_v28  ;;  %v1565_v33 = vmul.f32 %v1564_v24, %v1563_v22  ;;  %v1508_v9 = vmul.f32 %v1507_v29, %v1506_v27 }
 0x58b   :  { %2300 = vrcp.f32 %v2765_v18  ;;  %v1561_v44 = vadd.f32 3.0, %v1556_v28  ;;  %v1568_v48 = vadd.f32 7.0, %v1556_v28  ;;  %v1608_v50 = vadd.f32 6.0, %v2420_v14 }
 0x58c   :  { %v1560_v39 = vmul.f32 %v1559_v32, %v1558_v31  ;;  %v1567_v47 = vmul.f32 %v1566_v34, %v1565_v33  ;;  %v1503_v37 = vmul.f32 %v1502_v41, %v1501_v40  ;;  %v1510_v52 = vmul.f32 %v1509_v55, %v1508_v9 }
 0x58d   :  { %v1609_v62 = vmul.f32 %v1608_v50, %v1607_v36  ;;  %v1604_v46 = vmul.f32 %v1603_v56, %v1602_v58  ;;  %v1960_v28 = vadd.f32 -0.5, %v2758_v16  ;;  %v1961_v22 = vadd.f32 -0.5, %v2760_v17 }
 0x58e   :  { %v1562_v60 = vmul.f32 %v1561_v44, %v1560_v39  ;;  %v1569_v61 = vmul.f32 %v1568_v48, %v1567_v47  ;;  %v1962_v34 = vadd.f32 -0.5, %v2765_v18 }
 0x58f   :  { %v1611_v6 = vmul.f32 %v1610_v63, %v1609_v62 }
 0x593   :  { %v2775_v45 = vpop.eup %2296 }
 0x594   :  { %v1518_v57 = vmul.f32 %v2775_v45, %v2775_v45 }
 0x596   :  { %v1519_v3 = vmul.f32 0.0007936508, %v1518_v57 }
 0x597   :  { %v2778_v51 = vpop.eup %2298 }
 0x598   :  { %v1577_v11 = vmul.f32 %v2778_v51, %v2778_v51  ;;  %v2787_v13 = vpop.eup %2300  ;;  %v1520_v21 = vsub.f32 0.0027777778, %v1519_v3 }
 0x599   :  { %v1619_v14 = vmul.f32 %v2787_v13, %v2787_v13 }
 0x59a   :  { %v1578_v5 = vmul.f32 0.0007936508, %v1577_v11  ;;  %v1521_v27 = vmul.f32 %v1520_v21, %v1518_v57 }
 0x59b   :  { %v1620_v26 = vmul.f32 0.0007936508, %v1619_v14 }
 0x59c   :  { %v1579_v12 = vsub.f32 0.0027777778, %v1578_v5  ;;  %v1522_v41 = vsub.f32 0.083333336, %v1521_v27 }
 0x59d   :  { %v1621_v33 = vsub.f32 0.0027777778, %v1620_v26 }
 0x59e   :  { %v1580_v31 = vmul.f32 %v1579_v12, %v1577_v11 }
 0x59f   :  { %v1622_v39 = vmul.f32 %v1621_v33, %v1619_v14 }
 0x5a0   :  { %v1581_v42 = vsub.f32 0.083333336, %v1580_v31 }
 0x5a2   :  { %v1582_v57 = vmul.f32 %v2778_v51, %v1581_v42 }
 0x5b6   :  { %v1876_v27 = vpop.permute.xlu1 %1875 }
 0x5c0   :  { %v764_v25 = vpop.xlane.xlu0 %763 }
 0x5c1   :  { %2302 = vrcp.f32 %v764_v25 }
 0x5c2   :  { %2304 = vlog2.f32 %v2758_v16 }
 0x5c3   :  { %2306 = vlog2.f32 %v2760_v17 }
 0x5c4   :  { %2308 = vlog2.f32 %v2765_v18  ;;  %v155_v4 = vpop.xlane.xlu0 %154 }
 0x5c5   :  { %2310 = vlog2.f32 %v1495_v43 }
 0x5c6   :  { %2312 = vlog2.f32 %v1503_v37  ;;  %v1523_v37 = vmul.f32 %v2775_v45, %v1522_v41 }
 0x5c7   :  { %2314 = vlog2.f32 %v1510_v52 }
 0x5c8   :  { %2316 = vlog2.f32 %v1562_v60 }
 0x5c9   :  { %2318 = vlog2.f32 %v1569_v61  ;;  %v1623_v61 = vsub.f32 0.083333336, %v1622_v39 }
 0x5ca   :  { %2320 = vlog2.f32 %v1604_v46 }
 0x5cb   :  { %2322 = vlog2.f32 %v1611_v6  ;;  %v1624_v6 = vmul.f32 %v2787_v13, %v1623_v61 }
 0x5ce   :  { %v2303_v1 = vpop.eup %2302 }
 0x5cf   :  { %v766_v2 = vmul.f32 %v2303_v1, %v2713_v49  ;;  %v2305_v23 = vpop.eup %2304 }
 0x5d0   :  { %v2307_v7 = vpop.eup %2306  ;;  %v1526_v49 = vmul.f32 0.6931472, %v2305_v23 }
 0x5d1   :  { %v767_v8 = vmul.f32 %v766_v2, %v155_v4  ;;  %v1585_v24 = vmul.f32 0.6931472, %v2307_v7  ;;  %v2309_v53 = vpop.eup %2308 }
 0x5d2   :  { %v1527_v29 = vmul.f32 %v1960_v28, %v1526_v49  ;;  %v2311_v30 = vpop.eup %2310  ;;  %v1627_v35 = vmul.f32 0.6931472, %v2309_v53  ;;  %v1834_v53 = vpop.permute.xlu0 %1833 }
 0x5d3   :  { %v1538_v19 = vadd.f32 %v2751_v10, %v767_v8  ;;  %v1550_v20 = vadd.f32 1e-08, %v767_v8  ;;  %v1586_v32 = vmul.f32 %v1961_v22, %v1585_v24  ;;  %v2313_v38 = vpop.eup %2312  ;;  %v1497_v47 = vmul.f32 0.6931472, %v2311_v30 }
 0x5d4   :  { %v2315_v40 = vpop.eup %2314  ;;  %v1528_v9 = vsub.f32 %v1527_v29, %v2758_v16  ;;  %v1628_v44 = vmul.f32 %v1962_v34, %v1627_v35  ;;  %v1512_v36 = vmul.f32 0.6931472, %v2313_v38  ;;  %v1836_v13 = vsel %vm527_vm4, %v1834_v53, 0.0 }
 0x5d5   :  { %v1539_v25 = vadd.f32 1e-08, %v1538_v19  ;;  %2324 = vlog2.f32 %v1550_v20  ;;  %v2317_v55 = vpop.eup %2316  ;;  %v1587_v54 = vsub.f32 %v1586_v32, %v2760_v17  ;;  %v1514_v50 = vmul.f32 0.6931472, %v2315_v40 }
 0x5d6   :  { %v2319_v43 = vpop.eup %2318  ;;  %v1529_v52 = vadd.f32 0.9189385, %v1528_v9  ;;  %v1571_v58 = vmul.f32 0.6931472, %v2317_v55  ;;  %v1629_v11 = vsub.f32 %v1628_v44, %v2765_v18  ;;  %v1546_v62 = vrot.slane %v1497_v47, %v2646_v15 }
 0x5d7   :  { %2326 = vlog2.f32 %v1539_v25  ;;  %v2321_v48 = vpop.eup %2320  ;;  %v1573_v56 = vmul.f32 0.6931472, %v2319_v43  ;;  %v1588_v60 = vadd.f32 0.9189385, %v1587_v54  ;;  %v1515_v63 = vadd.f32 %v1514_v50, %v1512_v36 }
 0x5d8   :  { %v2323_v16 = vpop.eup %2322  ;;  %v1530_v1 = vadd.f32 %v1529_v52, %v1523_v37  ;;  %v1613_v23 = vmul.f32 0.6931472, %v2321_v48  ;;  %v1630_v51 = vadd.f32 0.9189385, %v1629_v11  ;;  %v1878_v29 = vsel %vm176_vm1, %v1876_v27, 0.0 }
 0x5d9   :  { %v1574_v2 = vadd.f32 %v1573_v56, %v1571_v58  ;;  %v1589_v3 = vadd.f32 %v1588_v60, %v1582_v57  ;;  %v1615_v45 = vmul.f32 0.6931472, %v2323_v16 }
 0x5da   :  { %v1531_v14 = vsub.f32 %v1530_v1, %v1515_v63  ;;  %v1631_v21 = vadd.f32 %v1630_v51, %v1624_v6 }
 0x5db   :  { %v1590_v28 = vsub.f32 %v1589_v3, %v1574_v2  ;;  %v1616_v20 = vadd.f32 %v1615_v45, %v1613_v23 }
 0x5dc   :  { %v1596_v12 = vrot.slane %v1531_v14, %v2646_v15 }
 0x5dd   :  { %v1632_v24 = vsub.f32 %v1631_v21, %v1616_v20 }
 0x5e2   :  { %v2325_v17 = vpop.eup %2324 }
 0x5e3   :  { %v1552_v5 = vmul.f32 0.6931472, %v2325_v17 }
 0x5e4   :  { %v2327_v46 = vpop.eup %2326 }
 0x5e5   :  { %v1541_v4 = vmul.f32 0.6931472, %v2327_v46 }
 0x5e7   :  { %v1548_v7 = vsub.f32 %v1546_v62, %v1541_v4  ;;  %v1553_v8 = vsub.f32 %v1552_v5, %v1541_v4 }
 0x5e9   :  { %v1549_v18 = vmul.f32 %v1548_v7, %v2751_v10  ;;  %v1554_v19 = vmul.f32 %v2754_v59, %v1553_v8  ;;  %v1882_v10 = vand.u32 127, %v1533_v0 }
 0x5eb   :  { %v1555_v49 = vadd.f32 %v1554_v19, %v1549_v18  ;;  %vm1885_vm5 = vcmp.eq.s32.totalorder %v1882_v10, 1  ;;  %vm1883_vm6 = vcmp.eq.s32.totalorder %v1882_v10, 0  ;;  %vm1888_vm7 = vcmp.eq.s32.totalorder %v1882_v10, 2 }
 0x5ec   :  { %vm1891_vm8 = vcmp.eq.s32.totalorder %v1882_v10, 3 }
 0x5ed   :  { %v1591_v22 = vadd.f32 %v1590_v28, %v1555_v49 }
 0x5ef   :  { %v1598_v25 = vsub.f32 %v1591_v22, %v1596_v12 }
 0x5f1   :  { %v1633_v26 = vsub.f32 %v1598_v25, %v1632_v24 }
 0x5f3   :  { %1634 = vadd.xlane.f32.xlu1 %v1633_v26 }
 0x5f7   :  { %1837 = vadd.xlane.f32.xlu1 %v1836_v13 }
 0x5fb   :  { %1879 = vadd.xlane.f32.xlu1 %v1878_v29 }
 0x613   :  { %v1819_v59 = vpop.xlane.xlu0 %1818 }
 0x614   :  { %v1820_v30 = vsub.f32 0.0, %v1819_v59 }
 0x616   :  { %v1886_v32 = vsel %vm1885_vm5, %v1820_v30, 0.0 }
 0x67c   :  { %v1635_v15 = vpop.xlane.xlu1 %1634 }
 0x67d   :  { %v1636_v31 = vsub.f32 0.0, %v1635_v15 }
 0x67f   :  { %v1884_v33 = vsel %vm1883_vm6, %v1636_v31, 0.0 }
 0x680   :  { %v1838_v34 = vpop.xlane.xlu1 %1837  ;;  %v1887_v35 = vadd.f32 %v1886_v32, %v1884_v33 }
 0x681   :  { %v1889_v38 = vsel %vm1888_vm7, %v1838_v34, 0.0 }
 0x682   :  { %v1890_v40 = vadd.f32 %v1889_v38, %v1887_v35 }
 0x684   :  { %v1880_v0 = vpop.xlane.xlu1 %1879 }
 0x685   :  { %v1892_v41 = vsel %vm1891_vm8, %v1880_v0, 0.0 }
 0x686   :  { %v1893_v9 = vadd.f32 %v1892_v41, %v1890_v40 }
 0x688   :  { %1894 = vst [vmem:[%s1933_s9] sm:$0xff] %v1893_v9 }

</bundles_post_ra>
